<compile_context>
chip_gen: v7x
topology: tpu7x:2x2x1
jax: 0.10.0
libtpu: 0.0.40
codegen_flags: <defaults>
</compile_context>

<pallas_src>
import functools

import jax
import jax.numpy as jnp
from jax import lax
from jax.experimental import pallas as pl
from jax.experimental.pallas import tpu as pltpu


def _round_up(x, m):
    return (x + m - 1) // m * m


def _lane_align(dim):
    # v6e/v7x MXUs are 2x256^2: keep large feature dims multiples of 256.
    # 128 is already optimal on v5e and for small dims (D=32 -> 128).
    return 256 if dim >= 256 else 128


def _single_buffer_supported():
    try:
        pl.BlockSpec((8, 128), lambda i: (0, 0), pipeline_mode=pl.Buffered(1))
        return True
    except Exception:
        return False


def _vmem_ceiling_bytes():
    # Generation-aware ceiling: ~80% of physical VMEM (v5e/v6e 128 MiB -> ~102,
    # v7x 64 MiB -> ~51).  Conservative fallback if the query is unavailable.
    try:
        cap = getattr(pltpu.get_tpu_info(), "vmem_capacity_bytes", None)
        if cap:
            return int(cap * 0.8)
    except Exception:
        pass
    return 51 * 2**20


# ----------------------------------------------------------------------------
# Kernels
# ----------------------------------------------------------------------------
def chain_kernel_resident(x_ref, win_ref, bin_ref, wout_ref, y_ref, y_acc,
                          *, B, unroll):
    # x_ref:   (TM, D_p)        activation tile
    # win_ref: (B, D_p, D_r_p)  resident inner-weight stack (y @ W layout)
    # bin_ref: (B, D_r_p)       resident inner-bias stack (lane-dense 2-D)
    # wout_ref:(B, D_r_p, D_p)  resident outer-weight stack (h @ W layout)
    # y_acc:   (TM, D_p) f32    scratch accumulator (used for the loop path)
    w_dtype = win_ref.dtype

    def block(y, w_in_i, bias_1xr, w_out_i):
        h = jnp.dot(y.astype(w_dtype), w_in_i,
                    preferred_element_type=jnp.float32)
        h = jnp.tanh(h + bias_1xr)                      # EUP tanh, f32 acc
        return x_ref[...].astype(jnp.float32) + jnp.dot(
            h.astype(w_dtype), w_out_i, preferred_element_type=jnp.float32)

    if B <= 4:
        # Small B: static unroll, hoisted bias load, y lives in vregs.
        b_all = bin_ref[...].astype(jnp.float32)        # (B, D_r_p), one load
        y = x_ref[...].astype(jnp.float32)
        for i in range(B):
            y = block(y, win_ref[i], b_all[i:i + 1], wout_ref[i])
        y_ref[...] = y.astype(y_ref.dtype)
    else:
        # Large B: VMEM accumulator bounds live ranges; unroll=2 lets the LLO
        # scheduler overlap block-(i+1) weight loads with block-i MXU pops.
        y_acc[...] = x_ref[...].astype(jnp.float32)

        def body(i, carry):
            y_acc[...] = block(y_acc[...], win_ref[i],
                               bin_ref[pl.ds(i, 1), :].astype(jnp.float32),
                               wout_ref[i])
            return carry

        lax.fori_loop(0, B, body, 0, unroll=unroll)
        y_ref[...] = y_acc[...].astype(y_ref.dtype)


def chain_kernel_stream(x_ref, bin_ref, win_hbm, wout_hbm, y_ref,
                        y_acc, win_buf, wout_buf, sems, *, B):
    # Weight-streaming path: W_in / W_out stay in HBM; per-block weights are
    # manually double-buffered (prefetch block i+1 while computing block i).
    # win_buf: (2, D_p, D_r_p) VMEM, wout_buf: (2, D_r_p, D_p) VMEM, sems: (2,2)
    w_dtype = win_buf.dtype

    def fetch(i, slot):
        pltpu.make_async_copy(win_hbm.at[i], win_buf.at[slot],
                              sems.at[0, slot]).start()
        pltpu.make_async_copy(wout_hbm.at[i], wout_buf.at[slot],
                              sems.at[1, slot]).start()

    fetch(0, 0)
    y_acc[...] = x_ref[...].astype(jnp.float32)

    @pl.loop(0, B)
    def _(i):
        slot = i & 1
        # Wait for block i's weights (src/dst only size the wait on the sem).
        pltpu.make_async_copy(win_hbm.at[0], win_buf.at[slot],
                              sems.at[0, slot]).wait()
        pltpu.make_async_copy(wout_hbm.at[0], wout_buf.at[slot],
                              sems.at[1, slot]).wait()

        @pl.when(i + 1 < B)
        def _():
            fetch(i + 1, 1 - slot)

        y = y_acc[...]
        h = jnp.dot(y.astype(w_dtype), win_buf[slot],
                    preferred_element_type=jnp.float32)
        h = jnp.tanh(h + bin_ref[pl.ds(i, 1), :].astype(jnp.float32))
        y_acc[...] = x_ref[...].astype(jnp.float32) + jnp.dot(
            h.astype(w_dtype), wout_buf[slot],
            preferred_element_type=jnp.float32)

    y_ref[...] = y_acc[...].astype(y_ref.dtype)


# ----------------------------------------------------------------------------
# Wrapper
# ----------------------------------------------------------------------------
def chain_forward(x, w_in, b_in, w_out, *, tile_m=512,
                  weight_dtype=jnp.bfloat16, force_stream=False,
                  interpret=False):
    """x: (N, D); w_in: (B, D, D_r); b_in: (B, D_r); w_out: (B, D_r, D)."""
    N, D = x.shape
    B, D_in, D_r = w_in.shape
    if b_in.ndim == 3:                      # accept legacy (B, 1, D_r)
        b_in = b_in.reshape(B, -1)
    assert D_in == D and w_out.shape == (B, D_r, D) and b_in.shape == (B, D_r)

    out_dtype = x.dtype
    w_dtype = jnp.dtype(weight_dtype) if weight_dtype is not None else w_in.dtype
    x_bytes = jnp.dtype(out_dtype).itemsize
    w_bytes = jnp.dtype(w_dtype).itemsize

    # Lane-align feature dims; size the batch tile so that the grid has at
    # least 4 steps when N allows it (2 per v7x TensorCore -> DMA overlap).
    D_p = _round_up(D, _lane_align(D))
    D_r_p = _round_up(D_r, _lane_align(D_r))
    n8 = _round_up(N, 8)
    tm = min(tile_m, max(8, _round_up((n8 + 3) // 4, 8)))
    tm = _round_up(min(tm, n8), 8)
    N_p = _round_up(N, tm)
    grid_m = N_p // tm

    # Zero padding is mathematically inert: padded weight rows/cols and padded
    # bias entries are zero, tanh(0)=0, so padded activation columns stay zero.
    if (N_p, D_p) != (N, D):
        x = jnp.pad(x, ((0, N_p - N), (0, D_p - D)))
    if (D_p, D_r_p) != (D, D_r):
        w_in = jnp.pad(w_in, ((0, 0), (0, D_p - D), (0, D_r_p - D_r)))
        b_in = jnp.pad(b_in, ((0, 0), (0, D_r_p - D_r)))
        w_out = jnp.pad(w_out, ((0, 0), (0, D_r_p - D_r), (0, D_p - D)))
    w_in = w_in.astype(w_dtype)
    b_in = b_in.astype(w_dtype)
    w_out = w_out.astype(w_dtype)

    # --- VMEM budget & mode selection -------------------------------------
    single_buf = _single_buffer_supported()
    wbuf = 1 if single_buf else 2           # actual buffering of resident specs
    ceiling = _vmem_ceiling_bytes()
    headroom = 6 * 2**20                    # Mosaic internal scratch etc.
    bias_vmem = wbuf * _round_up(B, 8) * D_r_p * w_bytes
    act_vmem = 2 * 2 * tm * D_p * x_bytes   # double-buffered x and y tiles
    acc_vmem = tm * D_p * 4                 # f32 scratch accumulator
    resident_w_vmem = wbuf * B * 2 * D_p * D_r_p * w_bytes
    resident_total = resident_w_vmem + bias_vmem + act_vmem + acc_vmem + headroom
    use_stream = force_stream or (resident_total > ceiling)

    def _const_spec(shape):
        # Constant index_map -> fetched once, resident across the grid.
        idx = lambda i: (0,) * len(shape)
        if single_buf:
            return pl.BlockSpec(shape, idx, pipeline_mode=pl.Buffered(1))
        return pl.BlockSpec(shape, idx)     # footprint doubled; accounted above

    x_spec = pl.BlockSpec((tm, D_p), lambda i: (i, 0))
    y_spec = pl.BlockSpec((tm, D_p), lambda i: (i, 0))

    cost = pl.CostEstimate(
        flops=4 * N_p * B * D_p * D_r_p,                 # two matmuls per block
        transcendentals=N_p * B * D_r_p,                 # tanh
        bytes_accessed=2 * N_p * D_p * x_bytes
        + (grid_m if use_stream else 1) * B * 2 * D_p * D_r_p * w_bytes,
    )

    if not use_stream:
        vmem_limit = int(min(max(resident_total, 32 * 2**20), ceiling))
        kernel = functools.partial(chain_kernel_resident, B=B,
                                   unroll=2 if B > 4 else 1)
        out = pl.pallas_call(
            kernel,
            out_shape=jax.ShapeDtypeStruct((N_p, D_p), out_dtype),
            grid_spec=pltpu.PrefetchScalarGridSpec(
                num_scalar_prefetch=0,
                grid=(grid_m,),
                in_specs=[
                    x_spec,
                    _const_spec((B, D_p, D_r_p)),        # W_in stack
                    _const_spec((B, D_r_p)),             # b_in stack (2-D)
                    _const_spec((B, D_r_p, D_p)),        # W_out stack
                ],
                out_specs=y_spec,
                scratch_shapes=[pltpu.VMEM((tm, D_p), jnp.float32)],
            ),
            compiler_params=pltpu.CompilerParams(
                dimension_semantics=("parallel",),
                vmem_limit_bytes=vmem_limit,
            ),
            cost_estimate=cost,
            interpret=interpret,
        )(x, w_in, b_in, w_out)
    else:
        stream_w_vmem = 2 * 2 * D_p * D_r_p * w_bytes    # double-buffered pair
        stream_total = stream_w_vmem + bias_vmem + act_vmem + acc_vmem + headroom
        vmem_limit = int(min(max(stream_total, 32 * 2**20), ceiling))
        kernel = functools.partial(chain_kernel_stream, B=B)
        out = pl.pallas_call(
            kernel,
            out_shape=jax.ShapeDtypeStruct((N_p, D_p), out_dtype),
            grid_spec=pltpu.PrefetchScalarGridSpec(
                num_scalar_prefetch=0,
                grid=(grid_m,),
                in_specs=[
                    x_spec,
                    _const_spec((B, D_r_p)),             # bias stays resident
                    pl.BlockSpec(memory_space=pl.ANY),   # W_in in HBM
                    pl.BlockSpec(memory_space=pl.ANY),   # W_out in HBM
                ],
                out_specs=y_spec,
                scratch_shapes=[
                    pltpu.VMEM((tm, D_p), jnp.float32),
                    pltpu.VMEM((2, D_p, D_r_p), w_dtype),
                    pltpu.VMEM((2, D_r_p, D_p), w_dtype),
                    pltpu.SemaphoreType.DMA((2, 2)),
                ],
            ),
            compiler_params=pltpu.CompilerParams(
                dimension_semantics=("parallel",),
                vmem_limit_bytes=vmem_limit,
            ),
            cost_estimate=cost,
            interpret=interpret,
        )(x, b_in, w_in, w_out)

    return out[:N, :D]


# ----------------------------------------------------------------------------
# References
# ----------------------------------------------------------------------------
def chain_reference_f32(x, w_in, b_in, w_out):
    xf = x.astype(jnp.float32)
    y = xf
    for i in range(w_in.shape[0]):
        h = jnp.tanh(
            jnp.dot(y, w_in[i].astype(jnp.float32),
                    precision=lax.Precision.HIGHEST,
                    preferred_element_type=jnp.float32)
            + b_in[i].astype(jnp.float32))
        y = xf + jnp.dot(h, w_out[i].astype(jnp.float32),
                         precision=lax.Precision.HIGHEST,
                         preferred_element_type=jnp.float32)
    return y.astype(x.dtype)


def chain_reference_quantized(x, w_in, b_in, w_out, w_dtype):
    # Mimics the kernel's casts exactly: operands quantized to w_dtype,
    # f32 MXU accumulation, f32 tanh.
    xf = x.astype(jnp.float32)
    y = xf
    for i in range(w_in.shape[0]):
        wi = w_in[i].astype(w_dtype)
        wo = w_out[i].astype(w_dtype)
        bi = b_in[i].astype(w_dtype).astype(jnp.float32)
        h = jnp.dot(y.astype(w_dtype), wi, preferred_element_type=jnp.float32)
        h = jnp.tanh(h + bi)
        y = xf + jnp.dot(h.astype(w_dtype), wo,
                         preferred_element_type=jnp.float32)
    return y.astype(x.dtype)


# ----------------------------------------------------------------------------
# Demo
# ----------------------------------------------------------------------------
if __name__ == "__main__":
    N, D, D_r, B = 512, 32, 64, 3

    key = jax.random.PRNGKey(0)
    kx, kwi, kbi, kwo, kwi2, kbi2, kwo2 = jax.random.split(key, 7)

    x = jax.random.normal(kx, (N, D), dtype=jnp.float32)
    w_in = jax.random.normal(kwi, (B, D, D_r), dtype=jnp.float32) / jnp.sqrt(D)
    b_in = jax.random.normal(kbi, (B, D_r), dtype=jnp.float32) * 0.1
    w_out = jax.random.normal(kwo, (B, D_r, D), dtype=jnp.float32) / jnp.sqrt(D_r)

    # 1) f32 weights, resident static-unroll path: tight check vs f32 reference.
    out_f32 = jax.block_until_ready(
        chain_forward(x, w_in, b_in, w_out, weight_dtype=jnp.float32))
    ref_f32 = chain_reference_f32(x, w_in, b_in, w_out)
    assert out_f32.shape == (N, D)
    assert jnp.allclose(out_f32, ref_f32, atol=2e-3, rtol=2e-3), "f32 mismatch"

    # 2) bf16 weights (default): compare against a bf16-faithful reference
    #    (y is re-quantized per block, so the f32 reference is only a loose check).
    out_bf16 = jax.block_until_ready(chain_forward(x, w_in, b_in, w_out))
    ref_bf16 = chain_reference_quantized(x, w_in, b_in, w_out, jnp.bfloat16)
    assert jnp.allclose(out_bf16, ref_bf16, atol=2e-3, rtol=2e-3), "bf16 mismatch"
    assert jnp.allclose(out_bf16, ref_f32, atol=5e-2, rtol=5e-2), "bf16 vs f32 drift"

    # 3) Larger B exercises the fori_loop(unroll=2) resident path and the
    #    weight-streaming (HBM + manual double-buffered DMA) path.
    B2 = 6
    w_in2 = jax.random.normal(kwi2, (B2, D, D_r), dtype=jnp.float32) / jnp.sqrt(D)
    b_in2 = jax.random.normal(kbi2, (B2, D_r), dtype=jnp.float32) * 0.1
    w_out2 = jax.random.normal(kwo2, (B2, D_r, D), dtype=jnp.float32) / jnp.sqrt(D_r)
    ref2 = chain_reference_quantized(x, w_in2, b_in2, w_out2, jnp.bfloat16)

    out_loop = jax.block_until_ready(chain_forward(x, w_in2, b_in2, w_out2))
    assert jnp.allclose(out_loop, ref2, atol=2e-3, rtol=2e-3), "loop-path mismatch"

    out_stream = jax.block_until_ready(
        chain_forward(x, w_in2, b_in2, w_out2, force_stream=True))
    assert jnp.allclose(out_stream, ref2, atol=2e-3, rtol=2e-3), "stream-path mismatch"

    print("KERNEL_OK")
</pallas_src>

<mosaic_0001>
module attributes {stable_mosaic.version = 11 : i64} {
  func.func @chain_kernel_resident(%arg0: i32, %arg1: memref<128x128xf32, #tpu.memory_space<vmem>>, %arg2: memref<3x128x128xf32, #tpu.memory_space<vmem>>, %arg3: memref<3x128xf32, #tpu.memory_space<vmem>>, %arg4: memref<3x128x128xf32, #tpu.memory_space<vmem>>, %arg5: memref<128x128xf32, #tpu.memory_space<vmem>>, %arg6: memref<128x128xf32, #tpu.memory_space<vmem>>) attributes {dimension_semantics = [#tpu.dimension_semantics<parallel>], iteration_bounds = array<i64: 4>, scalar_prefetch = 0 : i64, scratch_operands = 1 : i64, tpu.core_type = #tpu.core_type<tc>, window_params = [{transform_indices = @transform_0, window_bounds = array<i64: 128, 128>}, {pipeline_mode = #tpu.pipeline_mode<synchronous>, transform_indices = @transform_1, window_bounds = array<i64: 3, 128, 128>}, {pipeline_mode = #tpu.pipeline_mode<synchronous>, transform_indices = @transform_2, window_bounds = array<i64: 3, 128>}, {pipeline_mode = #tpu.pipeline_mode<synchronous>, transform_indices = @transform_3, window_bounds = array<i64: 3, 128, 128>}, {transform_indices = @transform_4, window_bounds = array<i64: 128, 128>}]} {
    %c0 = arith.constant 0 : index
    %c0_0 = arith.constant 0 : index
    %0 = vector.load %arg3[%c0, %c0_0] : memref<3x128xf32, #tpu.memory_space<vmem>>, vector<3x128xf32>
    %c0_1 = arith.constant 0 : index
    %c0_2 = arith.constant 0 : index
    %1 = vector.load %arg1[%c0_1, %c0_2] : memref<128x128xf32, #tpu.memory_space<vmem>>, vector<128x128xf32>
    %c0_3 = arith.constant 0 : index
    %c0_4 = arith.constant 0 : index
    %c0_5 = arith.constant 0 : index
    %2 = vector.load %arg2[%c0_3, %c0_4, %c0_5] : memref<3x128x128xf32, #tpu.memory_space<vmem>>, vector<1x128x128xf32>
    %3 = vector.shape_cast %2 : vector<1x128x128xf32> to vector<128x128xf32>
    %4 = vector.extract_strided_slice %0 {offsets = [0, 0], sizes = [1, 128], strides = [1, 1]} : vector<3x128xf32> to vector<1x128xf32>
    %c0_6 = arith.constant 0 : index
    %c0_7 = arith.constant 0 : index
    %c0_8 = arith.constant 0 : index
    %5 = vector.load %arg4[%c0_6, %c0_7, %c0_8] : memref<3x128x128xf32, #tpu.memory_space<vmem>>, vector<1x128x128xf32>
    %6 = vector.shape_cast %5 : vector<1x128x128xf32> to vector<128x128xf32>
    %cst = arith.constant dense<0.000000e+00> : vector<128x128xf32>
    %7 = tpu.matmul %1, %3, %cst {dimension_numbers = #tpu.dot_dimension_numbers<[1], [0], [0], [1], [0, 0, 1, 1], [], []>} : vector<128x128xf32>, vector<128x128xf32>, vector<128x128xf32> -> vector<128x128xf32>
    %8 = vector.broadcast %4 : vector<1x128xf32> to vector<128x128xf32>
    %9 = arith.addf %7, %8 : vector<128x128xf32>
    %10 = math.tanh %9 : vector<128x128xf32>
    %c0_9 = arith.constant 0 : index
    %c0_10 = arith.constant 0 : index
    %11 = vector.load %arg1[%c0_9, %c0_10] : memref<128x128xf32, #tpu.memory_space<vmem>>, vector<128x128xf32>
    %cst_11 = arith.constant dense<0.000000e+00> : vector<128x128xf32>
    %12 = tpu.matmul %10, %6, %cst_11 {dimension_numbers = #tpu.dot_dimension_numbers<[1], [0], [0], [1], [0, 0, 1, 1], [], []>} : vector<128x128xf32>, vector<128x128xf32>, vector<128x128xf32> -> vector<128x128xf32>
    %13 = arith.addf %11, %12 : vector<128x128xf32>
    %c1 = arith.constant 1 : index
    %c0_12 = arith.constant 0 : index
    %c0_13 = arith.constant 0 : index
    %14 = vector.load %arg2[%c1, %c0_12, %c0_13] : memref<3x128x128xf32, #tpu.memory_space<vmem>>, vector<1x128x128xf32>
    %15 = vector.shape_cast %14 : vector<1x128x128xf32> to vector<128x128xf32>
    %16 = vector.extract_strided_slice %0 {offsets = [1, 0], sizes = [1, 128], strides = [1, 1]} : vector<3x128xf32> to vector<1x128xf32>
    %c1_14 = arith.constant 1 : index
    %c0_15 = arith.constant 0 : index
    %c0_16 = arith.constant 0 : index
    %17 = vector.load %arg4[%c1_14, %c0_15, %c0_16] : memref<3x128x128xf32, #tpu.memory_space<vmem>>, vector<1x128x128xf32>
    %18 = vector.shape_cast %17 : vector<1x128x128xf32> to vector<128x128xf32>
    %cst_17 = arith.constant dense<0.000000e+00> : vector<128x128xf32>
    %19 = tpu.matmul %13, %15, %cst_17 {dimension_numbers = #tpu.dot_dimension_numbers<[1], [0], [0], [1], [0, 0, 1, 1], [], []>} : vector<128x128xf32>, vector<128x128xf32>, vector<128x128xf32> -> vector<128x128xf32>
    %20 = vector.broadcast %16 : vector<1x128xf32> to vector<128x128xf32>
    %21 = arith.addf %19, %20 : vector<128x128xf32>
    %22 = math.tanh %21 : vector<128x128xf32>
    %c0_18 = arith.constant 0 : index
    %c0_19 = arith.constant 0 : index
    %23 = vector.load %arg1[%c0_18, %c0_19] : memref<128x128xf32, #tpu.memory_space<vmem>>, vector<128x128xf32>
    %cst_20 = arith.constant dense<0.000000e+00> : vector<128x128xf32>
    %24 = tpu.matmul %22, %18, %cst_20 {dimension_numbers = #tpu.dot_dimension_numbers<[1], [0], [0], [1], [0, 0, 1, 1], [], []>} : vector<128x128xf32>, vector<128x128xf32>, vector<128x128xf32> -> vector<128x128xf32>
    %25 = arith.addf %23, %24 : vector<128x128xf32>
    %c2 = arith.constant 2 : index
    %c0_21 = arith.constant 0 : index
    %c0_22 = arith.constant 0 : index
    %26 = vector.load %arg2[%c2, %c0_21, %c0_22] : memref<3x128x128xf32, #tpu.memory_space<vmem>>, vector<1x128x128xf32>
    %27 = vector.shape_cast %26 : vector<1x128x128xf32> to vector<128x128xf32>
    %28 = vector.extract_strided_slice %0 {offsets = [2, 0], sizes = [1, 128], strides = [1, 1]} : vector<3x128xf32> to vector<1x128xf32>
    %c2_23 = arith.constant 2 : index
    %c0_24 = arith.constant 0 : index
    %c0_25 = arith.constant 0 : index
    %29 = vector.load %arg4[%c2_23, %c0_24, %c0_25] : memref<3x128x128xf32, #tpu.memory_space<vmem>>, vector<1x128x128xf32>
    %30 = vector.shape_cast %29 : vector<1x128x128xf32> to vector<128x128xf32>
    %cst_26 = arith.constant dense<0.000000e+00> : vector<128x128xf32>
    %31 = tpu.matmul %25, %27, %cst_26 {dimension_numbers = #tpu.dot_dimension_numbers<[1], [0], [0], [1], [0, 0, 1, 1], [], []>} : vector<128x128xf32>, vector<128x128xf32>, vector<128x128xf32> -> vector<128x128xf32>
    %32 = vector.broadcast %28 : vector<1x128xf32> to vector<128x128xf32>
    %33 = arith.addf %31, %32 : vector<128x128xf32>
    %34 = math.tanh %33 : vector<128x128xf32>
    %c0_27 = arith.constant 0 : index
    %c0_28 = arith.constant 0 : index
    %35 = vector.load %arg1[%c0_27, %c0_28] : memref<128x128xf32, #tpu.memory_space<vmem>>, vector<128x128xf32>
    %cst_29 = arith.constant dense<0.000000e+00> : vector<128x128xf32>
    %36 = tpu.matmul %34, %30, %cst_29 {dimension_numbers = #tpu.dot_dimension_numbers<[1], [0], [0], [1], [0, 0, 1, 1], [], []>} : vector<128x128xf32>, vector<128x128xf32>, vector<128x128xf32> -> vector<128x128xf32>
    %37 = arith.addf %35, %36 : vector<128x128xf32>
    %c0_30 = arith.constant 0 : index
    %c0_31 = arith.constant 0 : index
    %38 = vector.load %arg5[%c0_30, %c0_31] : memref<128x128xf32, #tpu.memory_space<vmem>>, vector<128x128xf32>
    tpu.vector_store %arg5[%c0_30, %c0_31], %37 {strides = array<i32>} : memref<128x128xf32, #tpu.memory_space<vmem>>, vector<128x128xf32>,
    return
  }
  func.func @transform_0(%arg0: i32) -> (i32, i32) {
    %c0_i32 = arith.constant 0 : i32
    %c0_i32_0 = arith.constant 0 : i32
    return %arg0, %c0_i32 : i32, i32
  }
  func.func @transform_1(%arg0: i32) -> (i32, i32, i32) {
    %c0_i32 = arith.constant 0 : i32
    %c0_i32_0 = arith.constant 0 : i32
    %c0_i32_1 = arith.constant 0 : i32
    %c0_i32_2 = arith.constant 0 : i32
    return %c0_i32, %c0_i32_0, %c0_i32_1 : i32, i32, i32
  }
  func.func @transform_2(%arg0: i32) -> (i32, i32) {
    %c0_i32 = arith.constant 0 : i32
    %c0_i32_0 = arith.constant 0 : i32
    %c0_i32_1 = arith.constant 0 : i32
    return %c0_i32, %c0_i32_0 : i32, i32
  }
  func.func @transform_3(%arg0: i32) -> (i32, i32, i32) {
    %c0_i32 = arith.constant 0 : i32
    %c0_i32_0 = arith.constant 0 : i32
    %c0_i32_1 = arith.constant 0 : i32
    %c0_i32_2 = arith.constant 0 : i32
    return %c0_i32, %c0_i32_0, %c0_i32_1 : i32, i32, i32
  }
  func.func @transform_4(%arg0: i32) -> (i32, i32) {
    %c0_i32 = arith.constant 0 : i32
    %c0_i32_0 = arith.constant 0 : i32
    return %arg0, %c0_i32 : i32, i32
  }
}

</mosaic_0001>

<bundles_post_ra>
// kernel: tpu_custom_call.1
= control target key start
LH: loop header
LB: loop body
LE: loop exit
PB: predicated region body
PF: predicated region fallthrough
CT: control target
= control target key end

     0   :  { %9 = vsyncpa [#allocation4], 0  ;;  %s3016_s0 = inlined_call_operand.hbm [shape: f32[512,128], index: 0, kind: input, shape index: {}]   ;;  %s3017_s1 = inlined_call_operand.hbm [shape: f32[3,128,128], index: 1, kind: input, shape index: {}]   ;;  %s3018_s2 = inlined_call_operand.vmem [shape: f32[3,128], index: 2, kind: input, shape index: {}]   ;;  %s3019_s3 = inlined_call_operand.hbm [shape: f32[3,128,128], index: 3, kind: input, shape index: {}]   ;;  %s3020_s4 = inlined_call_operand.hbm [shape: f32[512,128], index: 4, kind: output, shape index: {}]  }
   0x1   :  { %11 = vsyncpa [#allocation4 + $0x1], 0 }
   0x2   :  { %12 = vsyncpa [#allocation7], 0 }
   0x3   :  { %13 = vsyncpa [#allocation5], 0 }
   0x4   :  { %15 = vsyncpa [#allocation5 + $0x1], 0  ;;  %s2578_s15 = smov 0   ;;  %s2580_s16 = smov 0  }
   0x5   :  { %s2582_s17 = smov 0   ;;  %s2584_s18 = smov 0  }
   0x6 LB: > { %s2599_s19 = sadd.s32 4294967295, %s2543_s18   ;;  %s1464_s20 = sadd.s32 4294967294, %s2543_s18   ;;  %s2543_s18 = sphi %s2584_s18, %s3039_s18   ;;  %s2539_s17 = sphi %s2582_s17, %s3038_s17   ;;  %s2535_s16 = sphi %s2580_s16, %s3037_s16   ;;  %s2531_s15 = sphi %s2578_s15, %s3036_s15  }
   0x7   : > { %p41_p0 = scmp.ne.s32.totalorder %s2535_s16, %s2531_s15  ;;  %p3021_p1 = scmp.eq.s32.totalorder %s2599_s19, 0 }
   0x8   : > { %p134_p3 = scmp.eq.s32.totalorder %s1464_s20, 3  ;;  %p1465_p5 = scmp.ge.s32.totalorder %s2543_s18, 1 }
   0x9   : > { %p2608_p4 = por %p3021_p1, %p41_p0  ;;  %p141_p7 = scmp.lt.s32.totalorder %s2543_s18, 5 }
   0xa   : > { %p2613_p6 = por %p134_p3, %p41_p0  ;;  %s2545_s24 = smov [#allocation6]  }
   0xb   : > { %s3024_s21 = scalar_select %p2608_p4, 1, 0 }
   0xc   : > { %s3025_s22 = scalar_select %p2613_p6, 1, 0 }
   0xd   : > { %p2618_p8 = pnand %p1465_p5, %p141_p7  ;;  %s153_s25 = sshll.u32 %s2545_s24, 4  ;;  %s154_s25 = int_to_ptr.vmem [resolvable:$true] %s153_s25 }
   0xe   : > { %s2546_s27 = smov [#allocation8]   ;;  %s2387_s5 = scalar_lea.hbm %s3017_s1, 6144 }
   0xf   : > { %s3026_s23 = scalar_select %p2618_p8, 1, 0 }
  0x10   : > { %p2216_p9 = pneg %p2618_p8  ;;  %s169_s28 = sshll.u32 %s2546_s27, 4  ;;  %s2630_s28 = int_to_ptr.vmem [resolvable:$true] %s169_s28 }
  0x11   : > { %p2388_p11 = scmp.ne.s32.totalorder %s3017_s1, %s2387_s5  ;;  %p2394_p3 = scmp.lt.u32.totalorder %s2387_s5, %s3017_s1 }
  0x12   : > { %p2626_p10 = pnand %p2216_p9, %p3021_p1 }
  0x14   : > { %p2389_p12 = pneg %p2626_p10 }
  0x16   : > { %p2390_p13 = pnand %p2389_p12, %p2388_p11 }
  0x18   : > { %p2391_p0 = pneg %p2390_p13 }
  0x1a   : > { %p2396_p5 = pnand %p2394_p3, %p2391_p0 }
  0x1c   : > { %2399 = shalt.err (!%p2396_p5)
}
  0x1d   : > { %s2400_s10 = scalar_lea.vmem %s154_s25, 6144  ;;  %p2408_p2 = scmp.lt.s32.totalorder %s154_s25, %s154_s25 }
  0x1e   : > { %p2401_p7 = scmp.ne.s32.totalorder %s154_s25, %s2400_s10  ;;  %p2409_p6 = scmp.lt.s32.totalorder %s2400_s10, %s2400_s10 }
  0x20   : > { %p2403_p9 = pnand %p2401_p7, %p2389_p12  ;;  %p2410_p4 = por %p2409_p6, %p2408_p2 }
  0x22   : > { %p2404_p1 = pneg %p2403_p9 }
  0x24   : > { %p2411_p8 = pnand %p2410_p4, %p2404_p1 }
  0x26   : > { %2414 = shalt.err (!%p2411_p8)
}
  0x27   : > { %s2547_s11 = smov 128   ;;  %s2548_s12 = smov 8  }
  0x28   : > { %2219 = dma.hbm_to_vmem [thread:$0]  (!%p2626_p10), %s3017_s1, 6144, %s154_s25, [#allocation7], %s2547_s11, %s2547_s11, %s2548_s12  }
  0x29   : > { %s2415_s27 = scalar_lea.hbm %s3019_s3, 6144 }
  0x2a   : > { %p2416_p1 = scmp.ne.s32.totalorder %s3019_s3, %s2415_s27  ;;  %p2422_p6 = scmp.lt.u32.totalorder %s2415_s27, %s3019_s3 }
  0x2c   : > { %p2418_p2 = pnand %p2416_p1, %p2389_p12 }
  0x2e   : > { %p2419_p4 = pneg %p2418_p2 }
  0x30   : > { %p2424_p8 = pnand %p2422_p6, %p2419_p4 }
  0x32   : > { %2427 = shalt.err (!%p2424_p8)
}
  0x33   : > { %s2428_s25 = scalar_lea.vmem %s2630_s28, 6144  ;;  %p2436_p3 = scmp.lt.s32.totalorder %s2630_s28, %s2630_s28 }
  0x34   : > { %p2429_p11 = scmp.ne.s32.totalorder %s2630_s28, %s2428_s25  ;;  %p2437_p5 = scmp.lt.s32.totalorder %s2428_s25, %s2428_s25 }
  0x36   : > { %p2431_p13 = pnand %p2429_p11, %p2389_p12  ;;  %p2438_p7 = por %p2437_p5, %p2436_p3 }
  0x38   : > { %p2432_p0 = pneg %p2431_p13 }
  0x3a   : > { %p2439_p9 = pnand %p2438_p7, %p2432_p0 }
  0x3c   : > { %2442 = shalt.err (!%p2439_p9)
}
  0x3d   : > { %2222 = dma.hbm_to_vmem [thread:$0]  (!%p2626_p10), %s3019_s3, 6144, %s2630_s28, [#allocation7], %s2547_s11, %s2547_s11, %s2548_s12  }
  0x3e   : > { %s2686_s26 = sadd.s32 1, %s2543_s18   ;;  %s28_s9 = sadd.s32 1, %s2539_s17 }
  0x3f   : > { %s25_s10 = ssub.s32 %s2543_s18, %s2686_s26  ;;  %p35_p12 = scmp.ne.s32.totalorder %s2539_s17, %s2535_s16 }
  0x40   : > { %p26_p1 = scmp.eq.s32.totalorder %s25_s10, 0  ;;  %p36_p2 = scmp.eq.s32.totalorder %s2543_s18, 0 }
  0x41   : > { %p3028_p4 = scmp.eq.s32.totalorder %s2599_s19, 3  ;;  %p2233_p8 = scmp.lt.s32.totalorder %s2543_s18, 4 }
  0x42   : > { %s2702_s14 = scalar_select %p26_p1, %s2539_s17, %s28_s9  }
  0x43   : > { %p2696_p6 = por %p3028_p4, %p35_p12  ;;  %p37_p11 = por %p36_p2, %p35_p12 }
  0x44   : > { %s183_s20 = sand.u32 1, %s2539_s17   ;;  %s1482_s28 = sshll.u32 %s2543_s18, 11 }
  0x45   : > { %s1469_s24 = sshll.u32 %s183_s20, 7  ;;  %s2709_s30 = scalar_lea.hbm %s3016_s0, %s1482_s28 }
  0x46   : > { %s187_s5 = scalar_lea.vmem [#allocation3], %s1469_s24  ;;  %p2713_p10 = pnand %p2233_p8, %p37_p11 }
  0x47   : > { %s194_s6 = sshll.u32 %s187_s5, 4  ;;  %s2717_s7 = scalar_lea.sflag [#allocation4], %s183_s20  ;;  %s2711_s6 = int_to_ptr.vmem [resolvable:$true] %s194_s6 }
  0x48   : > { %s2443_s8 = scalar_lea.hbm %s2709_s30, 2048  ;;  %p2445_p0 = pneg %p2713_p10 }
  0x49   : > { %p2444_p13 = scmp.ne.s32.totalorder %s2709_s30, %s2443_s8  ;;  %s2448_s24 = scalar_lea.hbm %s3016_s0, 8192 }
  0x4a   : > { %p2449_p7 = scmp.lt.u32.totalorder %s2709_s30, %s3016_s0  ;;  %p2450_p9 = scmp.lt.u32.totalorder %s2448_s24, %s2443_s8 }
  0x4b   : > { %p2446_p3 = pnand %p2445_p0, %p2444_p13  ;;  %p2452_p1 = scmp.lt.u32.totalorder %s2443_s8, %s2709_s30 }
  0x4c   : > { %p2451_p12 = por %p2450_p9, %p2449_p7 }
  0x4d   : > { %p2447_p5 = pneg %p2446_p3 }
  0x4e   : > { %p2453_p2 = por %p2452_p1, %p2451_p12 }
  0x50   : > { %p2454_p4 = pnand %p2453_p2, %p2447_p5 }
  0x52   : > { %2457 = shalt.err (!%p2454_p4)
}
  0x53   : > { %s2458_s20 = scalar_lea.vmem %s2711_s6, 2048  ;;  %s2549_s29 = smov [#allocation3]  }
  0x54   : > { %p2459_p8 = scmp.ne.s32.totalorder %s2711_s6, %s2458_s20  ;;  %s2463_s5 = sshll.u32 %s2549_s29, 4  ;;  %s2464_s5 = int_to_ptr.vmem [resolvable:$false] %s2463_s5 }
  0x55   : > { %s2465_s9 = scalar_lea.vmem %s2464_s5, 4096  ;;  %p2466_p3 = scmp.lt.s32.totalorder %s2711_s6, %s2464_s5 }
  0x56   : > { %p2461_p11 = pnand %p2459_p8, %p2445_p0  ;;  %p2467_p7 = scmp.lt.s32.totalorder %s2465_s9, %s2458_s20 }
  0x58   : > { %p2462_p13 = pneg %p2461_p11  ;;  %p2468_p9 = por %p2467_p7, %p2466_p3 }
  0x5a   : > { %p2469_p12 = pnand %p2468_p9, %p2462_p13 }
  0x5c   : > { %2472 = shalt.err (!%p2469_p12)
}
  0x5d   : > { %2226 = dma.hbm_to_vmem [thread:$0]  (!%p2713_p10), %s2709_s30, 2048, %s2711_s6, %s2717_s7, %s2547_s11, %s2547_s11, %s2548_s12  }
  0x5e   : > { %p3031_p0 = scmp.ne.s32.totalorder %s3026_s23, 0 }
  0x5f   : > { %s2751_s8 = sand.u32 (!%p3031_p0), 1, %s2535_s16   ;;  %p3032_p5 = scmp.ne.s32.totalorder (!%p3031_p0), %s3024_s21, 0 }
  0x60   : > { %206 = sbr.rel (%p3031_p0) target bundleno = 1513 (0x5e9), region = 36  ;;  %s1473_s10 = sshll.u32 (!%p3031_p0), %s2751_s8, 7 }
  0x61   : > { %s209_s24 = scalar_lea.sflag (!%p3031_p0), [#allocation4], %s2751_s8  ;;  %s2757_s25 = scalar_lea.vmem (!%p3031_p0), [#allocation3], %s1473_s10 }
  0x67   : > { %2518 = dma.done.wait (%p3032_p5), %s209_s24, 2048  }
  0x68   : > { %2520 = vsyncadd (%p3032_p5), %s209_s24, 4294965248  ;;  %p3033_p10 = scmp.eq.s32.totalorder %s2599_s19, 0 }
  0x6a   : > { %2522 = dma.done.wait (%p3033_p10), [#allocation7], 12288   ;;  %p3034_p1 = pmov %p3033_p10 }
  0x6b   : > { %v264_v0 = vld [vmem:[#allocation6] sm:$0xff]  ;;  %v265_v1 = vld [vmem:[#allocation6 + $0x8] sm:$0xff]  ;;  %v266_v2 = vld [vmem:[#allocation6 + $0x10] sm:$0xff]  ;;  %s2934_s11 = scalar_lea.vmem [#allocation9], %s1473_s10  ;;  %s1483_s12 = sshll.u32 %s2599_s19, 11 }
  0x6c   : > { %2524 = vsyncadd (%p3034_p1), [#allocation7], 4294955008  ;;  %v2012_v3 = vpack.c.bf16 %v265_v1, %v264_v0  ;;  %v267_v4 = vld [vmem:[#allocation6 + $0x18] sm:$0xff]  ;;  %v268_v6 = vld [vmem:[#allocation6 + $0x20] sm:$0xff]  ;;  %s1372_s30 = sshll.u32 %s2934_s11, 4  ;;  %s2968_s28 = scalar_lea.hbm %s3020_s4, %s1483_s12  ;;  %s2970_s30 = int_to_ptr.vmem [resolvable:$true] %s1372_s30 }
  0x6d   : > { %v2016_v5 = vpack.c.bf16 %v267_v4, %v266_v2  ;;  %v269_v7 = vld [vmem:[#allocation6 + $0x28] sm:$0xff]  ;;  %v2768_v9 = vld [vmem:[%s2757_s25] sm:$0xff]  ;;  %v270_v10 = vld [vmem:[#allocation6 + $0x30] sm:$0xff]  ;;  %s1359_s19 = scalar_lea.sflag [#allocation5], %s2751_s8  ;;  %s2473_s27 = scalar_lea.vmem %s2970_s30, 2048 }
  0x6e   : > { %2013 = vmatprep.subr.bf16.mxu0 %v2012_v3  ;;  %v2020_v8 = vpack.c.bf16 %v269_v7, %v268_v6  ;;  %v271_v11 = vld [vmem:[#allocation6 + $0x38] sm:$0xff]  ;;  %1708 = vmatprep.mubr.f32.mxu0 %v2768_v9  ;;  %v272_v13 = vld [vmem:[#allocation6 + $0x40] sm:$0xff]  ;;  %v273_v14 = vld [vmem:[#allocation6 + $0x48] sm:$0xff]  ;;  %p2474_p2 = scmp.ne.s32.totalorder %s2970_s30, %s2473_s27  ;;  %s2550_s20 = smov [#allocation9]  }
  0x6f   : > { %2015 = vmatpush3.bf16.msra.mxu0 %v2012_v3  ;;  %v2024_v12 = vpack.c.bf16 %v271_v11, %v270_v10  ;;  %v280_v15 = vld [vmem:[#allocation8] sm:$0xff]  ;;  %v281_v16 = vld [vmem:[#allocation8 + $0x8] sm:$0xff]  ;;  %v282_v17 = vld [vmem:[#allocation8 + $0x10] sm:$0xff]  ;;  %v2028_v21 = vpack.c.bf16 %v273_v14, %v272_v13  ;;  %s2477_s29 = sshll.u32 %s2550_s20, 4  ;;  %s2478_s29 = int_to_ptr.vmem [resolvable:$false] %s2477_s29 }
  0x70   : > { %2017 = vmatprep.subr.bf16.mxu0 %v2016_v5  ;;  %v283_v18 = vld [vmem:[#allocation8 + $0x18] sm:$0xff]  ;;  %v2044_v19 = vpack.c.bf16 %v281_v16, %v280_v15  ;;  %v284_v22 = vld [vmem:[#allocation8 + $0x20] sm:$0xff]  ;;  %v285_v23 = vld [vmem:[#allocation8 + $0x28] sm:$0xff]  ;;  %p2475_p4 = pnand %p2474_p2, %p2696_p6  ;;  %s2479_s5 = scalar_lea.vmem %s2478_s29, 4096 }
  0x71   : > { %v2048_v20 = vpack.c.bf16 %v283_v18, %v282_v17  ;;  %v274_v24 = vld [vmem:[#allocation6 + $0x50] sm:$0xff]  ;;  %v275_v25 = vld [vmem:[#allocation6 + $0x58] sm:$0xff]  ;;  %v2052_v26 = vpack.c.bf16 %v285_v23, %v284_v22  ;;  %v276_v30 = vld [vmem:[#allocation6 + $0x60] sm:$0xff]  ;;  %v296_v22 = vlaneseq  ;;  %p2480_p11 = scmp.lt.s32.totalorder %s2970_s30, %s2478_s29  ;;  %p2481_p13 = scmp.lt.s32.totalorder %s2479_s5, %s2473_s27 }
  0x72   : > { %2045 = vmatprep.subr.bf16.mxu1 %v2044_v19  ;;  %v2032_v27 = vpack.c.bf16 %v275_v25, %v274_v24  ;;  %v286_v28 = vld [vmem:[#allocation8 + $0x30] sm:$0xff]  ;;  %v287_v29 = vld [vmem:[#allocation8 + $0x38] sm:$0xff]  ;;  %v277_v31 = vld [vmem:[#allocation6 + $0x68] sm:$0xff]  ;;  %p2476_p8 = pneg %p2475_p4 }
  0x73   : > { %2019 = vmatpush3.bf16.msra.mxu0 %v2016_v5  ;;  %2047 = vmatpush3.bf16.msra.mxu1 %v2044_v19  ;;  %v2056_v32 = vpack.c.bf16 %v287_v29, %v286_v28  ;;  %v2036_v33 = vpack.c.bf16 %v277_v31, %v276_v30  ;;  %v278_v34 = vld [vmem:[#allocation6 + $0x70] sm:$0xff]  ;;  %v279_v35 = vld [vmem:[#allocation6 + $0x78] sm:$0xff]  ;;  %v2772_v37 = vld [vmem:[%s2757_s25 + $0x8] sm:$0xff]  ;;  %v2831_v23 = vshrl.u32 %v296_v22, 7  ;;  %p2482_p3 = por %p2481_p13, %p2480_p11 }
  0x74   : > { %2021 = vmatprep.subr.bf16.mxu0 %v2020_v8  ;;  %2049 = vmatprep.subr.bf16.mxu1 %v2048_v20  ;;  %v2040_v36 = vpack.c.bf16 %v279_v35, %v278_v34  ;;  %v2775_v38 = vld [vmem:[%s2757_s25 + $0x10] sm:$0xff]  ;;  %v2780_v39 = vld [vmem:[%s2757_s25 + $0x18] sm:$0xff]  ;;  %v2783_v40 = vld [vmem:[%s2757_s25 + $0x20] sm:$0xff] }
  0x75   : > { %v2788_v41 = vld [vmem:[%s2757_s25 + $0x28] sm:$0xff]  ;;  %v2791_v42 = vld [vmem:[%s2757_s25 + $0x30] sm:$0xff]  ;;  %v2796_v43 = vld [vmem:[%s2757_s25 + $0x38] sm:$0xff]  ;;  %v298_v24 = vsub.s32 0, %v2831_v23  ;;  %p2483_p7 = pnand %p2482_p3, %p2476_p8 }
  0x76   : > { %v2799_v44 = vld [vmem:[%s2757_s25 + $0x40] sm:$0xff]  ;;  %v2804_v45 = vld [vmem:[%s2757_s25 + $0x48] sm:$0xff]  ;;  %v2807_v46 = vld [vmem:[%s2757_s25 + $0x50] sm:$0xff] }
  0x77   : > { %2023 = vmatpush3.bf16.msra.mxu0 %v2020_v8  ;;  %2051 = vmatpush3.bf16.msra.mxu1 %v2048_v20  ;;  %v2812_v47 = vld [vmem:[%s2757_s25 + $0x58] sm:$0xff]  ;;  %v2815_v48 = vld [vmem:[%s2757_s25 + $0x60] sm:$0xff]  ;;  %v2820_v49 = vld [vmem:[%s2757_s25 + $0x68] sm:$0xff] }
  0x78   : > { %2025 = vmatprep.subr.bf16.mxu0 %v2024_v12  ;;  %2053 = vmatprep.subr.bf16.mxu1 %v2052_v26  ;;  %v2823_v50 = vld [vmem:[%s2757_s25 + $0x70] sm:$0xff]  ;;  %v2828_v51 = vld [vmem:[%s2757_s25 + $0x78] sm:$0xff]  ;;  %v288_v52 = vld [vmem:[#allocation8 + $0x40] sm:$0xff] }
  0x79   : > { %v289_v53 = vld [vmem:[#allocation8 + $0x48] sm:$0xff]  ;;  %v290_v55 = vld [vmem:[#allocation8 + $0x50] sm:$0xff]  ;;  %v291_v56 = vld [vmem:[#allocation8 + $0x58] sm:$0xff] }
  0x7a   : > { %v2060_v54 = vpack.c.bf16 %v289_v53, %v288_v52  ;;  %v2064_v57 = vpack.c.bf16 %v291_v56, %v290_v55  ;;  %v292_v58 = vld [vmem:[#allocation8 + $0x60] sm:$0xff]  ;;  %v293_v59 = vld [vmem:[#allocation8 + $0x68] sm:$0xff]  ;;  %v294_v61 = vld [vmem:[#allocation8 + $0x70] sm:$0xff] }
  0x7b   : > { %2027 = vmatpush3.bf16.msra.mxu0 %v2024_v12  ;;  %2055 = vmatpush3.bf16.msra.mxu1 %v2052_v26  ;;  %v2068_v60 = vpack.c.bf16 %v293_v59, %v292_v58  ;;  %v295_v62 = vld [vmem:[#allocation8 + $0x78] sm:$0xff]  ;;  %v623_v0 = vld [vmem:[#allocation6 + $0x80] sm:$0xff]  ;;  %v624_v1 = vld [vmem:[#allocation6 + $0x88] sm:$0xff] }
  0x7c   : > { %2029 = vmatprep.subr.bf16.mxu0 %v2028_v21  ;;  %2057 = vmatprep.subr.bf16.mxu1 %v2056_v32  ;;  %v2072_v63 = vpack.c.bf16 %v295_v62, %v294_v61  ;;  %v625_v2 = vld [vmem:[#allocation6 + $0x90] sm:$0xff]  ;;  %v2076_v3 = vpack.c.bf16 %v624_v1, %v623_v0  ;;  %v626_v4 = vld [vmem:[#allocation6 + $0x98] sm:$0xff]  ;;  %v627_v6 = vld [vmem:[#allocation6 + $0xa0] sm:$0xff] }
  0x7d   : > { %v2080_v5 = vpack.c.bf16 %v626_v4, %v625_v2  ;;  %v628_v7 = vld [vmem:[#allocation6 + $0xa8] sm:$0xff]  ;;  %v629_v10 = vld [vmem:[#allocation6 + $0xb0] sm:$0xff]  ;;  %v630_v11 = vld [vmem:[#allocation6 + $0xb8] sm:$0xff] }
  0x7e   : > { %v2084_v8 = vpack.c.bf16 %v628_v7, %v627_v6  ;;  %v2088_v12 = vpack.c.bf16 %v630_v11, %v629_v10  ;;  %v631_v13 = vld [vmem:[#allocation6 + $0xc0] sm:$0xff]  ;;  %v632_v14 = vld [vmem:[#allocation6 + $0xc8] sm:$0xff]  ;;  %v633_v16 = vld [vmem:[#allocation6 + $0xd0] sm:$0xff] }
  0x7f   : > { %2031 = vmatpush3.bf16.msra.mxu0 %v2028_v21  ;;  %2059 = vmatpush3.bf16.msra.mxu1 %v2056_v32  ;;  %v2092_v15 = vpack.c.bf16 %v632_v14, %v631_v13  ;;  %v634_v17 = vld [vmem:[#allocation6 + $0xd8] sm:$0xff]  ;;  %v635_v19 = vld [vmem:[#allocation6 + $0xe0] sm:$0xff]  ;;  %v636_v20 = vld [vmem:[#allocation6 + $0xe8] sm:$0xff] }
  0x80   : > { %2033 = vmatprep.subr.bf16.mxu0 %v2032_v27  ;;  %2061 = vmatprep.subr.bf16.mxu1 %v2060_v54  ;;  %v2096_v18 = vpack.c.bf16 %v634_v17, %v633_v16  ;;  %v2100_v21 = vpack.c.bf16 %v636_v20, %v635_v19  ;;  %v2837_v25 = vld [vmem:[%s3018_s2] sm:$0x7] }
  0x81   : > { %v2840_v26 = vrot.slane %v2837_v25, %v298_v24 }
  0x83   : > { %2035 = vmatpush3.bf16.msra.mxu0 %v2032_v27  ;;  %2063 = vmatpush3.bf16.msra.mxu1 %v2060_v54 }
  0x84   : > { %2037 = vmatprep.subr.bf16.mxu0 %v2036_v33  ;;  %2065 = vmatprep.subr.bf16.mxu1 %v2064_v57 }
  0x87   : > { %2039 = vmatpush3.bf16.msra.mxu0 %v2036_v33  ;;  %2067 = vmatpush3.bf16.msra.mxu1 %v2064_v57 }
  0x88   : > { %2041 = vmatprep.subr.bf16.mxu0 %v2040_v36  ;;  %2069 = vmatprep.subr.bf16.mxu1 %v2068_v60 }
  0x8b   : > { %2043 = vmatpush3.bf16.msra.mxu0 %v2040_v36  ;;  %2071 = vmatpush3.bf16.msra.mxu1 %v2068_v60 }
  0x8c   : > { %2073 = vmatprep.subr.bf16.mxu1 %v2072_v63  ;;  %2077 = vmatprep.subr.bf16.mxu0 %v2076_v3 }
  0x8e   : > { %1709 = vmatmul.mubr.f32.vlgmr.msra.gmra.mrb[0].mxu0 %v2772_v37 }
  0x8f   : > { %1711 = vmatprep.mubr.f32.mxu0 %v2775_v38  ;;  %2075 = vmatpush3.bf16.msra.mxu1 %v2072_v63 }
  0x90   : > { %2079 = vmatpush3.bf16.msra.mxu0 %v2076_v3 }
  0x91   : > { %2081 = vmatprep.subr.bf16.mxu0 %v2080_v5 }
  0x92   : > { %1712 = vmatmul.mubr.f32.gmra.mrb[2].mxu0 %v2780_v39 }
  0x93   : > { %1714 = vmatprep.mubr.f32.mxu0 %v2783_v40 }
  0x94   : > { %2083 = vmatpush3.bf16.msra.mxu0 %v2080_v5 }
  0x95   : > { %2085 = vmatprep.subr.bf16.mxu0 %v2084_v8 }
  0x96   : > { %1715 = vmatmul.mubr.f32.gmra.mrb[4].mxu0 %v2788_v41 }
  0x97   : > { %1717 = vmatprep.mubr.f32.mxu0 %v2791_v42 }
  0x98   : > { %2087 = vmatpush3.bf16.msra.mxu0 %v2084_v8 }
  0x99   : > { %2089 = vmatprep.subr.bf16.mxu0 %v2088_v12 }
  0x9a   : > { %1718 = vmatmul.mubr.f32.gmra.mrb[6].mxu0 %v2796_v43 }
  0x9b   : > { %1720 = vmatprep.mubr.f32.mxu0 %v2799_v44 }
  0x9c   : > { %2091 = vmatpush3.bf16.msra.mxu0 %v2088_v12 }
  0x9d   : > { %2093 = vmatprep.subr.bf16.mxu0 %v2092_v15 }
  0x9e   : > { %1721 = vmatmul.mubr.f32.gmra.mrb[8].mxu0 %v2804_v45 }
  0x9f   : > { %1723 = vmatprep.mubr.f32.mxu0 %v2807_v46 }
  0xa0   : > { %2095 = vmatpush3.bf16.msra.mxu0 %v2092_v15 }
  0xa1   : > { %2097 = vmatprep.subr.bf16.mxu0 %v2096_v18 }
  0xa2   : > { %1724 = vmatmul.mubr.f32.gmra.mrb[10].mxu0 %v2812_v47 }
  0xa3   : > { %1726 = vmatprep.mubr.f32.mxu0 %v2815_v48 }
  0xa4   : > { %2099 = vmatpush3.bf16.msra.mxu0 %v2096_v18 }
  0xa5   : > { %2101 = vmatprep.subr.bf16.mxu0 %v2100_v21 }
  0xa6   : > { %1727 = vmatmul.mubr.f32.gmra.mrb[12].mxu0 %v2820_v49 }
  0xa7   : > { %1729 = vmatprep.mubr.f32.mxu0 %v2823_v50 }
  0xa8   : > { %2103 = vmatpush3.bf16.msra.mxu0 %v2100_v21 }
  0xaa   : > { %1730 = vmatmul.mubr.f32.gmra.mrb[14].mxu0 %v2828_v51 }
 0x161   : > { %v1710_v27 = vpop.f32.mrb[0].mxu0 }
 0x162   : > { %v372_v28 = vadd.f32 %v1710_v27, %v2840_v26  ;;  %v366_v29 = vpop.f32.mrb[1].mxu0 }
 0x163   : > { %v367_v30 = vadd.f32 %v366_v29, %v2840_v26 }
 0x165   : > { %2275 = vtanh.f32 %v367_v30  ;;  %v1713_v31 = vpop.f32.mrb[2].mxu0  ;;  %v637_v30 = vld [vmem:[#allocation6 + $0xf0] sm:$0xff] }
 0x166   : > { %2277 = vtanh.f32 %v372_v28  ;;  %v382_v32 = vadd.f32 %v1713_v31, %v2840_v26  ;;  %v376_v33 = vpop.f32.mrb[3].mxu0  ;;  %v638_v31 = vld [vmem:[#allocation6 + $0xf8] sm:$0xff] }
 0x167   : > { %v377_v34 = vadd.f32 %v376_v33, %v2840_v26  ;;  %v641_v33 = vld [vmem:[#allocation8 + $0x88] sm:$0xff] }
 0x169   : > { %2279 = vtanh.f32 %v377_v34  ;;  %v1716_v35 = vpop.f32.mrb[4].mxu0  ;;  %v642_v34 = vld [vmem:[#allocation8 + $0x90] sm:$0xff] }
 0x16a   : > { %2281 = vtanh.f32 %v382_v32  ;;  %v392_v36 = vadd.f32 %v1716_v35, %v2840_v26  ;;  %v386_v52 = vpop.f32.mrb[5].mxu0  ;;  %v640_v32 = vld [vmem:[#allocation8 + $0x80] sm:$0xff] }
 0x16b   : > { %v387_v53 = vadd.f32 %v386_v52, %v2840_v26  ;;  %v2108_v35 = vpack.c.bf16 %v641_v33, %v640_v32  ;;  %v650_v33 = vld [vmem:[#allocation8 + $0xd0] sm:$0xff] }
 0x16d   : > { %2283 = vtanh.f32 %v387_v53  ;;  %v1719_v54 = vpop.f32.mrb[6].mxu0  ;;  %v644_v53 = vld [vmem:[#allocation8 + $0xa0] sm:$0xff]  ;;  %2109 = vmatprep.subr.bf16.mxu1 %v2108_v35 }
 0x16e   : > { %2285 = vtanh.f32 %v392_v36  ;;  %v402_v55 = vadd.f32 %v1719_v54, %v2840_v26  ;;  %v396_v56 = vpop.f32.mrb[7].mxu0  ;;  %v643_v36 = vld [vmem:[#allocation8 + $0x98] sm:$0xff]  ;;  %v645_v54 = vld [vmem:[#allocation8 + $0xa8] sm:$0xff] }
 0x16f   : > { %v2276_v57 = vpop.eup %2275  ;;  %v397_v58 = vadd.f32 %v396_v56, %v2840_v26  ;;  %v2112_v52 = vpack.c.bf16 %v643_v36, %v642_v34  ;;  %v646_v56 = vld [vmem:[#allocation8 + $0xb0] sm:$0xff]  ;;  %v651_v34 = vld [vmem:[#allocation8 + $0xd8] sm:$0xff]  ;;  %v652_v36 = vld [vmem:[#allocation8 + $0xe0] sm:$0xff] }
 0x170   : > { %v2278_v59 = vpop.eup %2277  ;;  %1764 = vmatprep.mubr.f32.mxu1 %v2276_v57  ;;  %v647_v57 = vld [vmem:[#allocation8 + $0xb8] sm:$0xff] }
 0x171   : > { %2287 = vtanh.f32 %v397_v58  ;;  %v1722_v60 = vpop.f32.mrb[8].mxu0  ;;  %1765 = vmatmul.mubr.f32.vlgmr.msra.gmra.mrb[0].mxu1 %v2278_v59  ;;  %v2120_v58 = vpack.c.bf16 %v647_v57, %v646_v56  ;;  %v648_v59 = vld [vmem:[#allocation8 + $0xc0] sm:$0xff] }
 0x172   : > { %2289 = vtanh.f32 %v402_v55  ;;  %v412_v61 = vadd.f32 %v1722_v60, %v2840_v26  ;;  %v406_v62 = vpop.f32.mrb[9].mxu0  ;;  %2111 = vmatpush3.bf16.msra.mxu1 %v2108_v35  ;;  %v2116_v55 = vpack.c.bf16 %v645_v54, %v644_v53  ;;  %v649_v60 = vld [vmem:[#allocation8 + $0xc8] sm:$0xff]  ;;  %v2128_v35 = vpack.c.bf16 %v651_v34, %v650_v33  ;;  %v654_v54 = vld [vmem:[#allocation8 + $0xf0] sm:$0xff]  ;;  %v983_v57 = vld [vmem:[#allocation6 + $0x100] sm:$0xff] }
 0x173   : > { %v2280_v63 = vpop.eup %2279  ;;  %v407_v0 = vadd.f32 %v406_v62, %v2840_v26  ;;  %2113 = vmatprep.subr.bf16.mxu1 %v2112_v52 }
 0x174   : > { %v2282_v1 = vpop.eup %2281  ;;  %1767 = vmatprep.mubr.f32.mxu1 %v2280_v63 }
 0x175   : > { %2291 = vtanh.f32 %v407_v0  ;;  %v1725_v2 = vpop.f32.mrb[10].mxu0  ;;  %1768 = vmatmul.mubr.f32.gmra.mrb[2].mxu1 %v2282_v1 }
 0x176   : > { %2293 = vtanh.f32 %v412_v61  ;;  %v422_v3 = vadd.f32 %v1725_v2, %v2840_v26  ;;  %v416_v4 = vpop.f32.mrb[11].mxu0  ;;  %2115 = vmatpush3.bf16.msra.mxu1 %v2112_v52  ;;  %v2124_v61 = vpack.c.bf16 %v649_v60, %v648_v59  ;;  %v653_v52 = vld [vmem:[#allocation8 + $0xe8] sm:$0xff]  ;;  %v985_v59 = vld [vmem:[#allocation6 + $0x110] sm:$0xff] }
 0x177   : > { %v2284_v5 = vpop.eup %2283  ;;  %v417_v6 = vadd.f32 %v416_v4, %v2840_v26  ;;  %2117 = vmatprep.subr.bf16.mxu1 %v2116_v55  ;;  %v2132_v53 = vpack.c.bf16 %v653_v52, %v652_v36 }
 0x178   : > { %v2286_v7 = vpop.eup %2285  ;;  %1770 = vmatprep.mubr.f32.mxu1 %v2284_v5 }
 0x179   : > { %2295 = vtanh.f32 %v417_v6  ;;  %v1728_v8 = vpop.f32.mrb[12].mxu0  ;;  %1771 = vmatmul.mubr.f32.gmra.mrb[4].mxu1 %v2286_v7 }
 0x17a   : > { %2297 = vtanh.f32 %v422_v3  ;;  %v432_v10 = vadd.f32 %v1728_v8, %v2840_v26  ;;  %v426_v11 = vpop.f32.mrb[13].mxu0  ;;  %2119 = vmatpush3.bf16.msra.mxu1 %v2116_v55  ;;  %v655_v55 = vld [vmem:[#allocation8 + $0xf8] sm:$0xff] }
 0x17b   : > { %v2288_v12 = vpop.eup %2287  ;;  %v427_v13 = vadd.f32 %v426_v11, %v2840_v26  ;;  %2121 = vmatprep.subr.bf16.mxu1 %v2120_v58  ;;  %v2136_v56 = vpack.c.bf16 %v655_v55, %v654_v54 }
 0x17c   : > { %v2290_v14 = vpop.eup %2289  ;;  %1773 = vmatprep.mubr.f32.mxu1 %v2288_v12 }
 0x17d   : > { %2299 = vtanh.f32 %v427_v13  ;;  %v1731_v15 = vpop.f32.mrb[14].mxu0  ;;  %1774 = vmatmul.mubr.f32.gmra.mrb[6].mxu1 %v2290_v14 }
 0x17e   : > { %2301 = vtanh.f32 %v432_v10  ;;  %v442_v16 = vadd.f32 %v1731_v15, %v2840_v26  ;;  %v436_v17 = vpop.f32.mrb[15].mxu0  ;;  %2123 = vmatpush3.bf16.msra.mxu1 %v2120_v58  ;;  %v984_v58 = vld [vmem:[#allocation6 + $0x108] sm:$0xff] }
 0x17f   : > { %v2292_v18 = vpop.eup %2291  ;;  %v437_v19 = vadd.f32 %v436_v17, %v2840_v26  ;;  %v2104_v26 = vpack.c.bf16 %v638_v31, %v637_v30  ;;  %2125 = vmatprep.subr.bf16.mxu1 %v2124_v61  ;;  %v2140_v60 = vpack.c.bf16 %v984_v58, %v983_v57 }
 0x180   : > { %v2294_v20 = vpop.eup %2293  ;;  %1776 = vmatprep.mubr.f32.mxu1 %v2292_v18 }
 0x181   : > { %2303 = vtanh.f32 %v437_v19  ;;  %1777 = vmatmul.mubr.f32.gmra.mrb[8].mxu1 %v2294_v20  ;;  %2105 = vmatprep.subr.bf16.mxu0 %v2104_v26 }
 0x182   : > { %2305 = vtanh.f32 %v442_v16  ;;  %2107 = vmatpush3.bf16.msra.mxu0 %v2104_v26  ;;  %2127 = vmatpush3.bf16.msra.mxu1 %v2124_v61  ;;  %v986_v61 = vld [vmem:[#allocation6 + $0x118] sm:$0xff] }
 0x183   : > { %v2296_v21 = vpop.eup %2295  ;;  %2129 = vmatprep.subr.bf16.mxu1 %v2128_v35  ;;  %2141 = vmatprep.subr.bf16.mxu0 %v2140_v60 }
 0x184   : > { %v2298_v22 = vpop.eup %2297  ;;  %1779 = vmatprep.mubr.f32.mxu1 %v2296_v21 }
 0x185   : > { %1780 = vmatmul.mubr.f32.gmra.mrb[10].mxu1 %v2298_v22 }
 0x186   : > { %2131 = vmatpush3.bf16.msra.mxu1 %v2128_v35 }
 0x187   : > { %v2300_v24 = vpop.eup %2299  ;;  %2133 = vmatprep.subr.bf16.mxu1 %v2132_v53 }
 0x188   : > { %v2302_v27 = vpop.eup %2301  ;;  %1782 = vmatprep.mubr.f32.mxu1 %v2300_v24 }
 0x189   : > { %1783 = vmatmul.mubr.f32.gmra.mrb[12].mxu1 %v2302_v27 }
 0x18a   : > { %2135 = vmatpush3.bf16.msra.mxu1 %v2132_v53 }
 0x18b   : > { %v2304_v28 = vpop.eup %2303  ;;  %2137 = vmatprep.subr.bf16.mxu1 %v2136_v56 }
 0x18c   : > { %v2306_v29 = vpop.eup %2305  ;;  %1785 = vmatprep.mubr.f32.mxu1 %v2304_v28 }
 0x18d   : > { %1786 = vmatmul.mubr.f32.gmra.mrb[14].mxu1 %v2306_v29 }
 0x18e   : > { %2139 = vmatpush3.bf16.msra.mxu1 %v2136_v56 }
 0x244   : > { %v1766_v62 = vpop.f32.mrb[0].mxu1 }
 0x245   : > { %v527_v63 = vpop.f32.mrb[1].mxu1  ;;  %v607_v1 = vadd.f32 %v1766_v62, %v2772_v37  ;;  %v2144_v62 = vpack.c.bf16 %v986_v61, %v985_v59 }
 0x246   : > { %v606_v0 = vadd.f32 %v527_v63, %v2768_v9  ;;  %v987_v63 = vld [vmem:[#allocation6 + $0x120] sm:$0xff] }
 0x248   : > { %v1769_v2 = vpop.f32.mrb[2].mxu1  ;;  %1820 = vmatprep.mubr.f32.mxu0 %v606_v0  ;;  %v988_v0 = vld [vmem:[#allocation6 + $0x128] sm:$0xff] }
 0x249   : > { %v537_v3 = vpop.f32.mrb[3].mxu1  ;;  %1821 = vmatmul.mubr.f32.vlgmr.msra.gmra.mrb[16].mxu0 %v607_v1  ;;  %v609_v5 = vadd.f32 %v1769_v2, %v2780_v39  ;;  %v2148_v1 = vpack.c.bf16 %v988_v0, %v987_v63  ;;  %v989_v2 = vld [vmem:[#allocation6 + $0x130] sm:$0xff] }
 0x24a   : > { %v608_v4 = vadd.f32 %v537_v3, %v2775_v38  ;;  %2143 = vmatpush3.bf16.msra.mxu0 %v2140_v60  ;;  %v990_v3 = vld [vmem:[#allocation6 + $0x138] sm:$0xff] }
 0x24b   : > { %2145 = vmatprep.subr.bf16.mxu0 %v2144_v62 }
 0x24c   : > { %v1772_v6 = vpop.f32.mrb[4].mxu1  ;;  %1823 = vmatprep.mubr.f32.mxu0 %v608_v4  ;;  %v2152_v4 = vpack.c.bf16 %v990_v3, %v989_v2 }
 0x24d   : > { %v547_v7 = vpop.f32.mrb[5].mxu1  ;;  %1824 = vmatmul.mubr.f32.gmra.mrb[18].mxu0 %v609_v5  ;;  %v611_v10 = vadd.f32 %v1772_v6, %v2788_v41  ;;  %v991_v5 = vld [vmem:[#allocation6 + $0x140] sm:$0xff]  ;;  %v992_v6 = vld [vmem:[#allocation6 + $0x148] sm:$0xff] }
 0x24e   : > { %v610_v8 = vadd.f32 %v547_v7, %v2783_v40  ;;  %2147 = vmatpush3.bf16.msra.mxu0 %v2144_v62  ;;  %v2156_v7 = vpack.c.bf16 %v992_v6, %v991_v5 }
 0x24f   : > { %2149 = vmatprep.subr.bf16.mxu0 %v2148_v1 }
 0x250   : > { %v1775_v11 = vpop.f32.mrb[6].mxu1  ;;  %1826 = vmatprep.mubr.f32.mxu0 %v610_v8  ;;  %v993_v8 = vld [vmem:[#allocation6 + $0x150] sm:$0xff] }
 0x251   : > { %v557_v12 = vpop.f32.mrb[7].mxu1  ;;  %1827 = vmatmul.mubr.f32.gmra.mrb[20].mxu0 %v611_v10  ;;  %v613_v14 = vadd.f32 %v1775_v11, %v2796_v43  ;;  %v994_v10 = vld [vmem:[#allocation6 + $0x158] sm:$0xff] }
 0x252   : > { %v612_v13 = vadd.f32 %v557_v12, %v2791_v42  ;;  %2151 = vmatpush3.bf16.msra.mxu0 %v2148_v1  ;;  %v2160_v11 = vpack.c.bf16 %v994_v10, %v993_v8  ;;  %v995_v12 = vld [vmem:[#allocation6 + $0x160] sm:$0xff] }
 0x253   : > { %2153 = vmatprep.subr.bf16.mxu0 %v2152_v4 }
 0x254   : > { %v1778_v15 = vpop.f32.mrb[8].mxu1  ;;  %1829 = vmatprep.mubr.f32.mxu0 %v612_v13  ;;  %v996_v13 = vld [vmem:[#allocation6 + $0x168] sm:$0xff] }
 0x255   : > { %v567_v16 = vpop.f32.mrb[9].mxu1  ;;  %1830 = vmatmul.mubr.f32.gmra.mrb[22].mxu0 %v613_v14  ;;  %v615_v18 = vadd.f32 %v1778_v15, %v2804_v45  ;;  %v2164_v14 = vpack.c.bf16 %v996_v13, %v995_v12  ;;  %v658_v15 = vsub.s32 1, %v2831_v23 }
 0x256   : > { %v614_v17 = vadd.f32 %v567_v16, %v2799_v44  ;;  %2155 = vmatpush3.bf16.msra.mxu0 %v2152_v4 }
 0x257   : > { %2157 = vmatprep.subr.bf16.mxu0 %v2156_v7  ;;  %v2876_v16 = vrot.slane %v2837_v25, %v658_v15 }
 0x258   : > { %v1781_v19 = vpop.f32.mrb[10].mxu1  ;;  %1832 = vmatprep.mubr.f32.mxu0 %v614_v17 }
 0x259   : > { %v577_v20 = vpop.f32.mrb[11].mxu1  ;;  %1833 = vmatmul.mubr.f32.gmra.mrb[24].mxu0 %v615_v18  ;;  %v617_v22 = vadd.f32 %v1781_v19, %v2812_v47 }
 0x25a   : > { %v616_v21 = vadd.f32 %v577_v20, %v2807_v46  ;;  %2159 = vmatpush3.bf16.msra.mxu0 %v2156_v7 }
 0x25b   : > { %2161 = vmatprep.subr.bf16.mxu0 %v2160_v11 }
 0x25c   : > { %v1784_v24 = vpop.f32.mrb[12].mxu1  ;;  %1835 = vmatprep.mubr.f32.mxu0 %v616_v21 }
 0x25d   : > { %v587_v27 = vpop.f32.mrb[13].mxu1  ;;  %1836 = vmatmul.mubr.f32.gmra.mrb[26].mxu0 %v617_v22  ;;  %v619_v29 = vadd.f32 %v1784_v24, %v2820_v49 }
 0x25e   : > { %v618_v28 = vadd.f32 %v587_v27, %v2815_v48  ;;  %2163 = vmatpush3.bf16.msra.mxu0 %v2160_v11 }
 0x25f   : > { %2165 = vmatprep.subr.bf16.mxu0 %v2164_v14 }
 0x260   : > { %v1787_v30 = vpop.f32.mrb[14].mxu1  ;;  %1838 = vmatprep.mubr.f32.mxu0 %v618_v28 }
 0x261   : > { %v597_v31 = vpop.f32.mrb[15].mxu1  ;;  %1839 = vmatmul.mubr.f32.gmra.mrb[28].mxu0 %v619_v29  ;;  %v621_v32 = vadd.f32 %v1787_v30, %v2828_v51 }
 0x262   : > { %v620_v26 = vadd.f32 %v597_v31, %v2823_v50  ;;  %2167 = vmatpush3.bf16.msra.mxu0 %v2164_v14 }
 0x264   : > { %1841 = vmatprep.mubr.f32.mxu0 %v620_v26 }
 0x265   : > { %1842 = vmatmul.mubr.f32.gmra.mrb[30].mxu0 %v621_v32 }
 0x31c   : > { %v1822_v17 = vpop.f32.mrb[16].mxu0 }
 0x31d   : > { %v732_v18 = vadd.f32 %v1822_v17, %v2876_v16  ;;  %v726_v19 = vpop.f32.mrb[17].mxu0 }
 0x31e   : > { %v727_v20 = vadd.f32 %v726_v19, %v2876_v16 }
 0x320   : > { %2307 = vtanh.f32 %v727_v20  ;;  %v1825_v21 = vpop.f32.mrb[18].mxu0  ;;  %v997_v20 = vld [vmem:[#allocation6 + $0x170] sm:$0xff] }
 0x321   : > { %2309 = vtanh.f32 %v732_v18  ;;  %v742_v22 = vadd.f32 %v1825_v21, %v2876_v16  ;;  %v736_v24 = vpop.f32.mrb[19].mxu0  ;;  %v998_v21 = vld [vmem:[#allocation6 + $0x178] sm:$0xff] }
 0x322   : > { %v737_v27 = vadd.f32 %v736_v24, %v2876_v16  ;;  %v1001_v24 = vld [vmem:[#allocation8 + $0x108] sm:$0xff] }
 0x324   : > { %2311 = vtanh.f32 %v737_v27  ;;  %v1828_v28 = vpop.f32.mrb[20].mxu0  ;;  %v1002_v27 = vld [vmem:[#allocation8 + $0x110] sm:$0xff] }
 0x325   : > { %2313 = vtanh.f32 %v742_v22  ;;  %v752_v29 = vadd.f32 %v1828_v28, %v2876_v16  ;;  %v746_v30 = vpop.f32.mrb[21].mxu0  ;;  %v1000_v22 = vld [vmem:[#allocation8 + $0x100] sm:$0xff] }
 0x326   : > { %v747_v31 = vadd.f32 %v746_v30, %v2876_v16  ;;  %v2172_v28 = vpack.c.bf16 %v1001_v24, %v1000_v22 }
 0x328   : > { %2315 = vtanh.f32 %v747_v31  ;;  %v1831_v26 = vpop.f32.mrb[22].mxu0  ;;  %v1004_v31 = vld [vmem:[#allocation8 + $0x120] sm:$0xff]  ;;  %2173 = vmatprep.subr.bf16.mxu1 %v2172_v28 }
 0x329   : > { %2317 = vtanh.f32 %v752_v29  ;;  %v762_v32 = vadd.f32 %v1831_v26, %v2876_v16  ;;  %v756_v33 = vpop.f32.mrb[23].mxu0  ;;  %v1003_v29 = vld [vmem:[#allocation8 + $0x118] sm:$0xff]  ;;  %v1005_v26 = vld [vmem:[#allocation8 + $0x128] sm:$0xff] }
 0x32a   : > { %v2308_v34 = vpop.eup %2307  ;;  %v757_v35 = vadd.f32 %v756_v33, %v2876_v16  ;;  %v2176_v30 = vpack.c.bf16 %v1003_v29, %v1002_v27  ;;  %v1006_v33 = vld [vmem:[#allocation8 + $0x130] sm:$0xff] }
 0x32b   : > { %v2310_v36 = vpop.eup %2309  ;;  %1876 = vmatprep.mubr.f32.mxu1 %v2308_v34  ;;  %v1007_v34 = vld [vmem:[#allocation8 + $0x138] sm:$0xff] }
 0x32c   : > { %2319 = vtanh.f32 %v757_v35  ;;  %v1834_v52 = vpop.f32.mrb[24].mxu0  ;;  %1877 = vmatmul.mubr.f32.vlgmr.msra.gmra.mrb[16].mxu1 %v2310_v36  ;;  %v2184_v35 = vpack.c.bf16 %v1007_v34, %v1006_v33  ;;  %v1008_v36 = vld [vmem:[#allocation8 + $0x140] sm:$0xff] }
 0x32d   : > { %2321 = vtanh.f32 %v762_v32  ;;  %v772_v53 = vadd.f32 %v1834_v52, %v2876_v16  ;;  %v766_v54 = vpop.f32.mrb[25].mxu0  ;;  %2175 = vmatpush3.bf16.msra.mxu1 %v2172_v28  ;;  %v2180_v32 = vpack.c.bf16 %v1005_v26, %v1004_v31  ;;  %v1009_v52 = vld [vmem:[#allocation8 + $0x148] sm:$0xff] }
 0x32e   : > { %v2312_v55 = vpop.eup %2311  ;;  %v767_v56 = vadd.f32 %v766_v54, %v2876_v16  ;;  %2177 = vmatprep.subr.bf16.mxu1 %v2176_v30 }
 0x32f   : > { %v2314_v57 = vpop.eup %2313  ;;  %1879 = vmatprep.mubr.f32.mxu1 %v2312_v55 }
 0x330   : > { %2323 = vtanh.f32 %v767_v56  ;;  %v1837_v58 = vpop.f32.mrb[26].mxu0  ;;  %1880 = vmatmul.mubr.f32.gmra.mrb[18].mxu1 %v2314_v57 }
 0x331   : > { %2325 = vtanh.f32 %v772_v53  ;;  %v782_v59 = vadd.f32 %v1837_v58, %v2876_v16  ;;  %v776_v60 = vpop.f32.mrb[27].mxu0  ;;  %2179 = vmatpush3.bf16.msra.mxu1 %v2176_v30  ;;  %v2188_v53 = vpack.c.bf16 %v1009_v52, %v1008_v36 }
 0x332   : > { %v2316_v61 = vpop.eup %2315  ;;  %v777_v62 = vadd.f32 %v776_v60, %v2876_v16  ;;  %2181 = vmatprep.subr.bf16.mxu1 %v2180_v32 }
 0x333   : > { %v2318_v63 = vpop.eup %2317  ;;  %1882 = vmatprep.mubr.f32.mxu1 %v2316_v61 }
 0x334   : > { %2327 = vtanh.f32 %v777_v62  ;;  %v1840_v0 = vpop.f32.mrb[28].mxu0  ;;  %1883 = vmatmul.mubr.f32.gmra.mrb[20].mxu1 %v2318_v63 }
 0x335   : > { %2329 = vtanh.f32 %v782_v59  ;;  %v792_v1 = vadd.f32 %v1840_v0, %v2876_v16  ;;  %v786_v2 = vpop.f32.mrb[29].mxu0  ;;  %2183 = vmatpush3.bf16.msra.mxu1 %v2180_v32 }
 0x336   : > { %v2320_v3 = vpop.eup %2319  ;;  %v787_v4 = vadd.f32 %v786_v2, %v2876_v16  ;;  %2185 = vmatprep.subr.bf16.mxu1 %v2184_v35 }
 0x337   : > { %v2322_v5 = vpop.eup %2321  ;;  %1885 = vmatprep.mubr.f32.mxu1 %v2320_v3 }
 0x338   : > { %2331 = vtanh.f32 %v787_v4  ;;  %v1843_v6 = vpop.f32.mrb[30].mxu0  ;;  %1886 = vmatmul.mubr.f32.gmra.mrb[22].mxu1 %v2322_v5 }
 0x339   : > { %2333 = vtanh.f32 %v792_v1  ;;  %v802_v7 = vadd.f32 %v1843_v6, %v2876_v16  ;;  %v796_v8 = vpop.f32.mrb[31].mxu0  ;;  %2187 = vmatpush3.bf16.msra.mxu1 %v2184_v35 }
 0x33a   : > { %v2324_v10 = vpop.eup %2323  ;;  %v797_v11 = vadd.f32 %v796_v8, %v2876_v16  ;;  %v2168_v16 = vpack.c.bf16 %v998_v21, %v997_v20  ;;  %2189 = vmatprep.subr.bf16.mxu1 %v2188_v53 }
 0x33b   : > { %v2326_v12 = vpop.eup %2325  ;;  %1888 = vmatprep.mubr.f32.mxu1 %v2324_v10 }
 0x33c   : > { %2335 = vtanh.f32 %v797_v11  ;;  %1889 = vmatmul.mubr.f32.gmra.mrb[24].mxu1 %v2326_v12  ;;  %2169 = vmatprep.subr.bf16.mxu0 %v2168_v16 }
 0x33d   : > { %2337 = vtanh.f32 %v802_v7  ;;  %2171 = vmatpush3.bf16.msra.mxu0 %v2168_v16  ;;  %2191 = vmatpush3.bf16.msra.mxu1 %v2188_v53 }
 0x33e   : > { %v2328_v13 = vpop.eup %2327 }
 0x33f   : > { %v2330_v14 = vpop.eup %2329  ;;  %1891 = vmatprep.mubr.f32.mxu1 %v2328_v13 }
 0x340   : > { %1892 = vmatmul.mubr.f32.gmra.mrb[26].mxu1 %v2330_v14  ;;  %v1012_v14 = vld [vmem:[#allocation8 + $0x160] sm:$0xff] }
 0x342   : > { %v2332_v15 = vpop.eup %2331 }
 0x343   : > { %v2334_v17 = vpop.eup %2333  ;;  %1894 = vmatprep.mubr.f32.mxu1 %v2332_v15  ;;  %v1013_v15 = vld [vmem:[#allocation8 + $0x168] sm:$0xff] }
 0x344   : > { %1895 = vmatmul.mubr.f32.gmra.mrb[28].mxu1 %v2334_v17  ;;  %v1015_v17 = vld [vmem:[#allocation8 + $0x178] sm:$0xff] }
 0x346   : > { %v2336_v18 = vpop.eup %2335 }
 0x347   : > { %v2338_v19 = vpop.eup %2337  ;;  %1897 = vmatprep.mubr.f32.mxu1 %v2336_v18 }
 0x348   : > { %1898 = vmatmul.mubr.f32.gmra.mrb[30].mxu1 %v2338_v19 }
 0x3ff   : > { %v1878_v54 = vpop.f32.mrb[16].mxu1 }
 0x400   : > { %v887_v55 = vpop.f32.mrb[17].mxu1  ;;  %v967_v57 = vadd.f32 %v1878_v54, %v2772_v37 }
 0x401   : > { %v966_v56 = vadd.f32 %v887_v55, %v2768_v9 }
 0x403   : > { %v1881_v58 = vpop.f32.mrb[18].mxu1  ;;  %1932 = vmatprep.mubr.f32.mxu0 %v966_v56 }
 0x404   : > { %v897_v59 = vpop.f32.mrb[19].mxu1  ;;  %1933 = vmatmul.mubr.f32.vlgmr.msra.gmra.mrb[32].mxu0 %v967_v57  ;;  %v969_v61 = vadd.f32 %v1881_v58, %v2780_v39 }
 0x405   : > { %v968_v60 = vadd.f32 %v897_v59, %v2775_v38 }
 0x407   : > { %v1884_v62 = vpop.f32.mrb[20].mxu1  ;;  %1935 = vmatprep.mubr.f32.mxu0 %v968_v60 }
 0x408   : > { %v907_v63 = vpop.f32.mrb[21].mxu1  ;;  %1936 = vmatmul.mubr.f32.gmra.mrb[34].mxu0 %v969_v61  ;;  %v971_v1 = vadd.f32 %v1884_v62, %v2788_v41 }
 0x409   : > { %v970_v0 = vadd.f32 %v907_v63, %v2783_v40 }
 0x40b   : > { %v1887_v2 = vpop.f32.mrb[22].mxu1  ;;  %1938 = vmatprep.mubr.f32.mxu0 %v970_v0 }
 0x40c   : > { %v917_v9 = vpop.f32.mrb[23].mxu1  ;;  %1939 = vmatmul.mubr.f32.gmra.mrb[36].mxu0 %v971_v1  ;;  %v973_v3 = vadd.f32 %v1887_v2, %v2796_v43 }
 0x40d   : > { %v972_v37 = vadd.f32 %v917_v9, %v2791_v42 }
 0x40f   : > { %v1890_v4 = vpop.f32.mrb[24].mxu1  ;;  %1941 = vmatprep.mubr.f32.mxu0 %v972_v37 }
 0x410   : > { %v927_v38 = vpop.f32.mrb[25].mxu1  ;;  %1942 = vmatmul.mubr.f32.gmra.mrb[38].mxu0 %v973_v3  ;;  %v975_v5 = vadd.f32 %v1890_v4, %v2804_v45 }
 0x411   : > { %v974_v39 = vadd.f32 %v927_v38, %v2799_v44 }
 0x413   : > { %v1893_v6 = vpop.f32.mrb[26].mxu1  ;;  %1944 = vmatprep.mubr.f32.mxu0 %v974_v39 }
 0x414   : > { %v937_v40 = vpop.f32.mrb[27].mxu1  ;;  %1945 = vmatmul.mubr.f32.gmra.mrb[40].mxu0 %v975_v5  ;;  %v977_v7 = vadd.f32 %v1893_v6, %v2812_v47  ;;  %v1011_v47 = vld [vmem:[#allocation8 + $0x158] sm:$0xff] }
 0x415   : > { %v976_v41 = vadd.f32 %v937_v40, %v2807_v46  ;;  %v1010_v46 = vld [vmem:[#allocation8 + $0x150] sm:$0xff] }
 0x416   : > { %v2192_v13 = vpack.c.bf16 %v1011_v47, %v1010_v46 }
 0x417   : > { %v1896_v8 = vpop.f32.mrb[28].mxu1  ;;  %1947 = vmatprep.mubr.f32.mxu0 %v976_v41 }
 0x418   : > { %v947_v42 = vpop.f32.mrb[29].mxu1  ;;  %1948 = vmatmul.mubr.f32.gmra.mrb[42].mxu0 %v977_v7  ;;  %v979_v10 = vadd.f32 %v1896_v8, %v2820_v49  ;;  %2193 = vmatprep.subr.bf16.mxu1 %v2192_v13  ;;  %v1014_v49 = vld [vmem:[#allocation8 + $0x170] sm:$0xff] }
 0x419   : > { %v978_v43 = vadd.f32 %v947_v42, %v2815_v48  ;;  %2195 = vmatpush3.bf16.msra.mxu1 %v2192_v13  ;;  %v2196_v48 = vpack.c.bf16 %v1013_v15, %v1012_v14  ;;  %v2200_v18 = vpack.c.bf16 %v1015_v17, %v1014_v49  ;;  %v2373_v13 = vld [vmem:[%s2757_s25 + $0x18] sm:$0xff] }
 0x41b   : > { %v1899_v11 = vpop.f32.mrb[30].mxu1  ;;  %1950 = vmatprep.mubr.f32.mxu0 %v978_v43  ;;  %2197 = vmatprep.subr.bf16.mxu1 %v2196_v48 }
 0x41c   : > { %v957_v44 = vpop.f32.mrb[31].mxu1  ;;  %1951 = vmatmul.mubr.f32.gmra.mrb[44].mxu0 %v979_v10  ;;  %v981_v12 = vadd.f32 %v1899_v11, %v2828_v51  ;;  %v2371_v11 = vld [vmem:[%s2757_s25 + $0x8] sm:$0xff] }
 0x41d   : > { %v980_v45 = vadd.f32 %v957_v44, %v2823_v50  ;;  %2199 = vmatpush3.bf16.msra.mxu1 %v2196_v48  ;;  %v1018_v50 = vsub.s32 2, %v2831_v23  ;;  %v2374_v48 = vld [vmem:[%s2757_s25 + $0x10] sm:$0xff] }
 0x41e   : > { %2201 = vmatprep.subr.bf16.mxu1 %v2200_v18 }
 0x41f   : > { %1953 = vmatprep.mubr.f32.mxu0 %v980_v45  ;;  %v2912_v51 = vrot.slane %v2837_v25, %v1018_v50 }
 0x420   : > { %1954 = vmatmul.mubr.f32.gmra.mrb[46].mxu0 %v981_v12  ;;  %v2372_v12 = vld [vmem:[%s2757_s25] sm:$0xff] }
 0x421   : > { %2203 = vmatpush3.bf16.msra.mxu1 %v2200_v18  ;;  %v2375_v18 = vld [vmem:[%s2757_s25 + $0x28] sm:$0xff] }
 0x4d7   : > { %v1934_v19 = vpop.f32.mrb[32].mxu0 }
 0x4d8   : > { %v1092_v20 = vadd.f32 %v1934_v19, %v2912_v51  ;;  %v1086_v21 = vpop.f32.mrb[33].mxu0  ;;  %v2376_v19 = vld [vmem:[%s2757_s25 + $0x20] sm:$0xff] }
 0x4d9   : > { %v1087_v16 = vadd.f32 %v1086_v21, %v2912_v51 }
 0x4db   : > { %2339 = vtanh.f32 %v1087_v16  ;;  %v1937_v22 = vpop.f32.mrb[34].mxu0  ;;  %v2377_v16 = vld [vmem:[%s2757_s25 + $0x38] sm:$0xff] }
 0x4dc   : > { %2341 = vtanh.f32 %v1092_v20  ;;  %v1102_v24 = vadd.f32 %v1937_v22, %v2912_v51  ;;  %v1096_v27 = vpop.f32.mrb[35].mxu0 }
 0x4dd   : > { %v1097_v28 = vadd.f32 %v1096_v27, %v2912_v51  ;;  %v2378_v27 = vld [vmem:[%s2757_s25 + $0x30] sm:$0xff] }
 0x4df   : > { %2343 = vtanh.f32 %v1097_v28  ;;  %v1940_v29 = vpop.f32.mrb[36].mxu0 }
 0x4e0   : > { %2345 = vtanh.f32 %v1102_v24  ;;  %v1112_v23 = vadd.f32 %v1940_v29, %v2912_v51  ;;  %v1106_v25 = vpop.f32.mrb[37].mxu0 }
 0x4e1   : > { %v1107_v30 = vadd.f32 %v1106_v25, %v2912_v51 }
 0x4e3   : > { %2347 = vtanh.f32 %v1107_v30  ;;  %v1943_v31 = vpop.f32.mrb[38].mxu0 }
 0x4e4   : > { %2349 = vtanh.f32 %v1112_v23  ;;  %v1122_v26 = vadd.f32 %v1943_v31, %v2912_v51  ;;  %v1116_v32 = vpop.f32.mrb[39].mxu0  ;;  %v2379_v23 = vld [vmem:[%s2757_s25 + $0x48] sm:$0xff]  ;;  %v2380_v31 = vld [vmem:[%s2757_s25 + $0x40] sm:$0xff] }
 0x4e5   : > { %v2340_v33 = vpop.eup %2339  ;;  %v1117_v34 = vadd.f32 %v1116_v32, %v2912_v51 }
 0x4e6   : > { %v2342_v35 = vpop.eup %2341  ;;  %1988 = vmatprep.mubr.f32.mxu1 %v2340_v33  ;;  %v2381_v33 = vld [vmem:[%s2757_s25 + $0x58] sm:$0xff] }
 0x4e7   : > { %2351 = vtanh.f32 %v1117_v34  ;;  %v1946_v36 = vpop.f32.mrb[40].mxu0  ;;  %1989 = vmatmul.mubr.f32.vlgmr.msra.gmra.mrb[32].mxu1 %v2342_v35 }
 0x4e8   : > { %2353 = vtanh.f32 %v1122_v26  ;;  %v1132_v52 = vadd.f32 %v1946_v36, %v2912_v51  ;;  %v1126_v53 = vpop.f32.mrb[41].mxu0  ;;  %v2382_v36 = vld [vmem:[%s2757_s25 + $0x50] sm:$0xff] }
 0x4e9   : > { %v2344_v54 = vpop.eup %2343  ;;  %v1127_v55 = vadd.f32 %v1126_v53, %v2912_v51 }
 0x4ea   : > { %v2346_v56 = vpop.eup %2345  ;;  %1991 = vmatprep.mubr.f32.mxu1 %v2344_v54  ;;  %v2383_v54 = vld [vmem:[%s2757_s25 + $0x68] sm:$0xff] }
 0x4eb   : > { %2355 = vtanh.f32 %v1127_v55  ;;  %v1949_v57 = vpop.f32.mrb[42].mxu0  ;;  %1992 = vmatmul.mubr.f32.gmra.mrb[34].mxu1 %v2346_v56 }
 0x4ec   : > { %2357 = vtanh.f32 %v1132_v52  ;;  %v1142_v58 = vadd.f32 %v1949_v57, %v2912_v51  ;;  %v1136_v59 = vpop.f32.mrb[43].mxu0  ;;  %v2384_v57 = vld [vmem:[%s2757_s25 + $0x60] sm:$0xff] }
 0x4ed   : > { %v2348_v60 = vpop.eup %2347  ;;  %v1137_v61 = vadd.f32 %v1136_v59, %v2912_v51 }
 0x4ee   : > { %v2350_v62 = vpop.eup %2349  ;;  %1994 = vmatprep.mubr.f32.mxu1 %v2348_v60  ;;  %v2385_v60 = vld [vmem:[%s2757_s25 + $0x78] sm:$0xff] }
 0x4ef   : > { %2359 = vtanh.f32 %v1137_v61  ;;  %v1952_v63 = vpop.f32.mrb[44].mxu0  ;;  %1995 = vmatmul.mubr.f32.gmra.mrb[36].mxu1 %v2350_v62 }
 0x4f0   : > { %2361 = vtanh.f32 %v1142_v58  ;;  %v1152_v0 = vadd.f32 %v1952_v63, %v2912_v51  ;;  %v1146_v1 = vpop.f32.mrb[45].mxu0  ;;  %v2386_v63 = vld [vmem:[%s2757_s25 + $0x70] sm:$0xff] }
 0x4f1   : > { %v2352_v2 = vpop.eup %2351  ;;  %v1147_v9 = vadd.f32 %v1146_v1, %v2912_v51 }
 0x4f2   : > { %v2354_v37 = vpop.eup %2353  ;;  %1997 = vmatprep.mubr.f32.mxu1 %v2352_v2 }
 0x4f3   : > { %2363 = vtanh.f32 %v1147_v9  ;;  %v1955_v3 = vpop.f32.mrb[46].mxu0  ;;  %1998 = vmatmul.mubr.f32.gmra.mrb[38].mxu1 %v2354_v37 }
 0x4f4   : > { %2365 = vtanh.f32 %v1152_v0  ;;  %v1162_v4 = vadd.f32 %v1955_v3, %v2912_v51  ;;  %v1156_v38 = vpop.f32.mrb[47].mxu0 }
 0x4f5   : > { %v2356_v39 = vpop.eup %2355  ;;  %v1157_v5 = vadd.f32 %v1156_v38, %v2912_v51 }
 0x4f6   : > { %v2358_v6 = vpop.eup %2357  ;;  %2000 = vmatprep.mubr.f32.mxu1 %v2356_v39 }
 0x4f7   : > { %2367 = vtanh.f32 %v1157_v5  ;;  %2001 = vmatmul.mubr.f32.gmra.mrb[40].mxu1 %v2358_v6 }
 0x4f8   : > { %2369 = vtanh.f32 %v1162_v4 }
 0x4f9   : > { %v2360_v40 = vpop.eup %2359 }
 0x4fa   : > { %v2362_v41 = vpop.eup %2361  ;;  %2003 = vmatprep.mubr.f32.mxu1 %v2360_v40 }
 0x4fb   : > { %2004 = vmatmul.mubr.f32.gmra.mrb[42].mxu1 %v2362_v41 }
 0x4fd   : > { %v2364_v7 = vpop.eup %2363 }
 0x4fe   : > { %v2366_v8 = vpop.eup %2365  ;;  %2006 = vmatprep.mubr.f32.mxu1 %v2364_v7 }
 0x4ff   : > { %2007 = vmatmul.mubr.f32.gmra.mrb[44].mxu1 %v2366_v8 }
 0x501   : > { %v2368_v42 = vpop.eup %2367 }
 0x502   : > { %v2370_v43 = vpop.eup %2369  ;;  %2009 = vmatprep.mubr.f32.mxu1 %v2368_v42 }
 0x503   : > { %2010 = vmatmul.mubr.f32.gmra.mrb[46].mxu1 %v2370_v43 }
 0x5ba   : > { %v1990_v10 = vpop.f32.mrb[32].mxu1 }
 0x5bb   : > { %v1327_v44 = vadd.f32 %v2371_v11, %v1990_v10  ;;  %v1247_v45 = vpop.f32.mrb[33].mxu1 }
 0x5bc   : > { %v1326_v46 = vadd.f32 %v2372_v12, %v1247_v45 }
 0x5bd   : > { %1343 = vst [vmem:[%s2934_s11 + $0x8] sm:$0xff] %v1327_v44 }
 0x5be   : > { %1342 = vst [vmem:[%s2934_s11] sm:$0xff] %v1326_v46  ;;  %v1993_v47 = vpop.f32.mrb[34].mxu1 }
 0x5bf   : > { %v1329_v14 = vadd.f32 %v2373_v13, %v1993_v47  ;;  %v1257_v15 = vpop.f32.mrb[35].mxu1 }
 0x5c0   : > { %v1328_v49 = vadd.f32 %v2374_v48, %v1257_v15 }
 0x5c1   : > { %1345 = vst [vmem:[%s2934_s11 + $0x18] sm:$0xff] %v1329_v14 }
 0x5c2   : > { %1344 = vst [vmem:[%s2934_s11 + $0x10] sm:$0xff] %v1328_v49  ;;  %v1996_v17 = vpop.f32.mrb[36].mxu1 }
 0x5c3   : > { %v1331_v50 = vadd.f32 %v2375_v18, %v1996_v17  ;;  %v1267_v51 = vpop.f32.mrb[37].mxu1 }
 0x5c4   : > { %v1330_v20 = vadd.f32 %v2376_v19, %v1267_v51 }
 0x5c5   : > { %1347 = vst [vmem:[%s2934_s11 + $0x28] sm:$0xff] %v1331_v50 }
 0x5c6   : > { %1346 = vst [vmem:[%s2934_s11 + $0x20] sm:$0xff] %v1330_v20  ;;  %v1999_v21 = vpop.f32.mrb[38].mxu1 }
 0x5c7   : > { %v1333_v22 = vadd.f32 %v2377_v16, %v1999_v21  ;;  %v1277_v24 = vpop.f32.mrb[39].mxu1 }
 0x5c8   : > { %v1332_v28 = vadd.f32 %v2378_v27, %v1277_v24 }
 0x5c9   : > { %1349 = vst [vmem:[%s2934_s11 + $0x38] sm:$0xff] %v1333_v22 }
 0x5ca   : > { %1348 = vst [vmem:[%s2934_s11 + $0x30] sm:$0xff] %v1332_v28  ;;  %v2002_v29 = vpop.f32.mrb[40].mxu1 }
 0x5cb   : > { %v1335_v25 = vadd.f32 %v2379_v23, %v2002_v29  ;;  %v1287_v30 = vpop.f32.mrb[41].mxu1 }
 0x5cc   : > { %v1334_v26 = vadd.f32 %v2380_v31, %v1287_v30 }
 0x5cd   : > { %1351 = vst [vmem:[%s2934_s11 + $0x48] sm:$0xff] %v1335_v25 }
 0x5ce   : > { %1350 = vst [vmem:[%s2934_s11 + $0x40] sm:$0xff] %v1334_v26  ;;  %v2005_v32 = vpop.f32.mrb[42].mxu1 }
 0x5cf   : > { %v1337_v34 = vadd.f32 %v2381_v33, %v2005_v32  ;;  %v1297_v35 = vpop.f32.mrb[43].mxu1 }
 0x5d0   : > { %v1336_v52 = vadd.f32 %v2382_v36, %v1297_v35 }
 0x5d1   : > { %1353 = vst [vmem:[%s2934_s11 + $0x58] sm:$0xff] %v1337_v34 }
 0x5d2   : > { %1352 = vst [vmem:[%s2934_s11 + $0x50] sm:$0xff] %v1336_v52  ;;  %v2008_v53 = vpop.f32.mrb[44].mxu1 }
 0x5d3   : > { %v1339_v55 = vadd.f32 %v2383_v54, %v2008_v53  ;;  %v1307_v56 = vpop.f32.mrb[45].mxu1 }
 0x5d4   : > { %v1338_v58 = vadd.f32 %v2384_v57, %v1307_v56 }
 0x5d5   : > { %1355 = vst [vmem:[%s2934_s11 + $0x68] sm:$0xff] %v1339_v55 }
 0x5d6   : > { %1354 = vst [vmem:[%s2934_s11 + $0x60] sm:$0xff] %v1338_v58  ;;  %v2011_v59 = vpop.f32.mrb[46].mxu1 }
 0x5d7   : > { %v1341_v61 = vadd.f32 %v2385_v60, %v2011_v59  ;;  %v1317_v62 = vpop.f32.mrb[47].mxu1 }
 0x5d8   : > { %v1340_v0 = vadd.f32 %v2386_v63, %v1317_v62 }
 0x5d9   : > { %1357 = vst [vmem:[%s2934_s11 + $0x78] sm:$0xff] %v1341_v61 }
 0x5da   : > { %1356 = vst [vmem:[%s2934_s11 + $0x70] sm:$0xff] %v1340_v0 }
 0x5db   : > { %2486 = shalt.err (!%p2483_p7)
}
 0x5dc   : > { %s2487_s9 = scalar_lea.hbm %s2968_s28, 2048  ;;  %s2491_s25 = scalar_lea.hbm %s3020_s4, 8192 }
 0x5dd   : > { %p2488_p9 = scmp.ne.s32.totalorder %s2968_s28, %s2487_s9  ;;  %p2492_p5 = scmp.lt.u32.totalorder %s2968_s28, %s3020_s4 }
 0x5de   : > { %p2493_p10 = scmp.lt.u32.totalorder %s2491_s25, %s2487_s9  ;;  %p2495_p2 = scmp.lt.u32.totalorder %s2487_s9, %s2968_s28 }
 0x5df   : > { %p2489_p12 = pnand %p2488_p9, %p2696_p6 }
 0x5e0   : > { %p2494_p1 = por %p2493_p10, %p2492_p5 }
 0x5e1   : > { %p2490_p0 = pneg %p2489_p12 }
 0x5e2   : > { %p2496_p4 = por %p2495_p2, %p2494_p1 }
 0x5e4   : > { %p2497_p8 = pnand %p2496_p4, %p2490_p0 }
 0x5e6   : > { %2500 = shalt.err (!%p2497_p8)
}
 0x5e7   : > { %s2551_s11 = smov 128   ;;  %s2552_s12 = smov 8  }
 0x5e8   : > { %2214 = dma.vmem_to_hbm [thread:$0]  (%p2696_p6), %s2970_s30, 2048, %s2968_s28, %s1359_s19, %s2551_s11, %s2551_s11, %s2552_s12  }
 0x5e9 PF: > { %p2236_p11 = scmp.ge.s32.totalorder %s2543_s18, 2  ;;  %s1387_s6 = sand.u32 1, %s2531_s15  }
 0x5ea   : > { %p3035_p13 = scmp.ne.s32.totalorder %s3025_s22, 0  ;;  %s1388_s7 = scalar_lea.sflag [#allocation5], %s1387_s6 }
 0x5ec   : > { %p2228_p3 = pnand %p2236_p11, %p3035_p13 }
 0x5ee   : > { %2526 = dma.done.wait (!%p2228_p3), %s1388_s7, 2048  }
 0x5ef   : > { %2528 = vsyncadd (!%p2228_p3), %s1388_s7, 4294965248  ;;  %p18_p7 = scmp.ge.s32.totalorder %s2686_s26, 6   ;;  %s3036_s15 = smov %s2535_s16 }
 0x5f0   : > { %s3037_s16 = smov %s2539_s17  ;;  %s3038_s17 = smov %s2702_s14 }
 0x5f1   : > { %s3039_s18 = smov %s2686_s26  ;;  %20 = sbr.rel (!%p18_p7) target bundleno = 6 (0x6), region = 93 }
 0x5f8   :  { %1393 = vsyncpa [#allocation4], 1 }
 0x5f9   :  { %1395 = vsyncpa [#allocation4 + $0x1], 1 }
 0x5fa   :  { %1396 = vsyncpa [#allocation7], 1 }
 0x5fb   :  { %1397 = vsyncpa [#allocation5], 1 }
 0x5fc   :  { %1399 = vsyncpa [#allocation5 + $0x1], 1 }

</bundles_post_ra>
